<compile_context>
chip_gen: v7x
topology: tpu7x:2x2x1
jax: 0.10.0
libtpu: 0.0.40
codegen_flags: <defaults>
</compile_context>

<pallas_src>
import jax
import jax.numpy as jnp
from jax import lax
from jax.experimental import pallas as pl
from jax.experimental.pallas import tpu as pltpu


# ------------------------------ tiling helpers -------------------------------
def _round_up(v, m):
    return ((v + m - 1) // m) * m


def _choose_tiles(n, tm_target=1024, tk_target=2048):
    """Pick (n_pad, tm, tk): big tiles for big graphs, minimal padding for small."""
    q = 256  # safe quantum for int8 (32,128) / bf16 (16,128) / f32 (8,128) tiling
    n_pad = _round_up(n, q)
    if n_pad <= tk_target:
        tk = n_pad                      # single k tile -> Y stays VMEM-resident
        tm = q
        for cand in (tm_target, 512, 256):
            if cand <= n_pad and n_pad % cand == 0:
                tm = cand
                break
        return n_pad, tm, tk
    n_pad = _round_up(n, 512)           # limit padding waste to < 512 rows
    tm = 1024 if n_pad % 1024 == 0 else 512
    tk = 2048 if n_pad % 2048 == 0 else (1024 if n_pad % 1024 == 0 else 512)
    return n_pad, tm, tk


# ------------------------------ Pallas kernels --------------------------------
def _layer1_kernel(adj_ref, y_ref, dinv_ref, b1_ref, w2_ref, out_ref, acc_ref):
    """Fused layer 1: out = dinv * (relu(dinv * (A+I)@Y1 + b1) @ W2), bf16."""
    k = pl.program_id(1)

    @pl.when(k == 0)
    def _():
        acc_ref[...] = jnp.zeros_like(acc_ref)

    acc_ref[...] += jnp.dot(
        adj_ref[...].astype(jnp.bfloat16),           # int8 counts -> bf16 (exact)
        y_ref[...],
        preferred_element_type=jnp.float32,
    )

    @pl.when(k == pl.num_programs(1) - 1)
    def _():
        d = dinv_ref[...]                                         # (tm, 1) f32
        h = jnp.maximum(d * acc_ref[...] + b1_ref[...], 0.0)      # relu(A_norm X W1 + b1)
        hw2 = jnp.dot(h.astype(jnp.bfloat16), w2_ref[...],
                      preferred_element_type=jnp.float32)
        out_ref[...] = (d * hw2).astype(out_ref.dtype)            # pre-scaled Y for layer 2


def _layer2_kernel(adj_ref, y_ref, dinv_ref, b2_ref, out_ref):
    """Layer 2: out = dinv * (A+I)@Y2 + b2, accumulated directly into out_ref."""
    k = pl.program_id(1)

    @pl.when(k == 0)
    def _():
        out_ref[...] = jnp.zeros_like(out_ref)

    out_ref[...] += jnp.dot(
        adj_ref[...].astype(jnp.bfloat16),
        y_ref[...],
        preferred_element_type=jnp.float32,
    )

    @pl.when(k == pl.num_programs(1) - 1)
    def _():
        out_ref[...] = dinv_ref[...] * out_ref[...] + b2_ref[...]


_CPARAMS = pltpu.CompilerParams(
    dimension_semantics=("parallel", "arbitrary"),
    vmem_limit_bytes=48 * 1024 * 1024,   # > v5e 16 MiB default, < v7x 64 MiB physical
)


def _layer1(adj_i8, y1_bf16, dinv, b1, w2_bf16, tm, tk):
    n_pad = adj_i8.shape[0]
    hid = y1_bf16.shape[1]
    outc = w2_bf16.shape[1]
    grid = (n_pad // tm, n_pad // tk)
    return pl.pallas_call(
        _layer1_kernel,
        out_shape=jax.ShapeDtypeStruct((n_pad, outc), jnp.bfloat16),
        grid_spec=pltpu.PrefetchScalarGridSpec(
            num_scalar_prefetch=0,
            grid=grid,
            in_specs=[
                pl.BlockSpec((tm, tk), lambda i, k: (i, k)),     # A+I counts (int8)
                pl.BlockSpec((tk, hid), lambda i, k: (k, 0)),    # dinv-scaled X W1 (bf16)
                pl.BlockSpec((tm, 1), lambda i, k: (i, 0)),      # dinv rows (f32)
                pl.BlockSpec((1, hid), lambda i, k: (0, 0)),     # b1 (f32)
                pl.BlockSpec((hid, outc), lambda i, k: (0, 0)),  # W2 (bf16, resident)
            ],
            out_specs=pl.BlockSpec((tm, outc), lambda i, k: (i, 0)),
            scratch_shapes=[pltpu.VMEM((tm, hid), jnp.float32)],
        ),
        compiler_params=_CPARAMS,
    )(adj_i8, y1_bf16, dinv, b1, w2_bf16)


def _layer2(adj_i8, y2_bf16, dinv, b2, tm, tk):
    n_pad = adj_i8.shape[0]
    outc = y2_bf16.shape[1]
    grid = (n_pad // tm, n_pad // tk)
    return pl.pallas_call(
        _layer2_kernel,
        out_shape=jax.ShapeDtypeStruct((n_pad, outc), jnp.float32),
        grid_spec=pltpu.PrefetchScalarGridSpec(
            num_scalar_prefetch=0,
            grid=grid,
            in_specs=[
                pl.BlockSpec((tm, tk), lambda i, k: (i, k)),     # A+I counts (int8)
                pl.BlockSpec((tk, outc), lambda i, k: (k, 0)),   # layer-1 output (bf16)
                pl.BlockSpec((tm, 1), lambda i, k: (i, 0)),      # dinv rows (f32)
                pl.BlockSpec((1, outc), lambda i, k: (0, 0)),    # b2 (f32)
            ],
            out_specs=pl.BlockSpec((tm, outc), lambda i, k: (i, 0)),
        ),
        compiler_params=_CPARAMS,
    )(adj_i8, y2_bf16, dinv, b2)


# ------------------------------- GCN forward ---------------------------------
def gcn_forward(x, edge_index, w1, b1, w2, b2):
    """out = A_norm @ relu(A_norm @ (X W1) + b1) @ W2 + b2  (PyG GCNConv x2)."""
    n, in_c = x.shape
    hidden = w1.shape[1]
    out_c = w2.shape[1]
    n_pad, tm, tk = _choose_tiles(n)
    hid_pad = _round_up(hidden, 128)
    out_pad = _round_up(out_c, 128)

    src, dst = edge_index[0], edge_index[1]
    loop = jnp.arange(n, dtype=src.dtype)

    # (A + I) edge counts built directly as padded int8 (no f32 N^2 intermediate).
    # TODO(synk): block-sparse aggregation (scalar-prefetch-driven k-block skip)
    # for realistic sparse graphs is not implemented; this is dense O(N^2).
    adj = (
        jnp.zeros((n_pad, n_pad), jnp.int8)
        .at[dst, src].add(jnp.ones(src.shape, jnp.int8))
        .at[loop, loop].add(jnp.ones((n,), jnp.int8))
    )

    # Symmetric-normalization degrees from the edge list; padded rows -> dinv = 0.
    deg = jnp.zeros((n_pad,), jnp.float32).at[dst].add(1.0).at[loop].add(1.0)
    dinv = jnp.where(deg > 0, lax.rsqrt(deg), 0.0).reshape(n_pad, 1)

    # Tiny channel matmul X @ W1 in plain XLA; rows pre-scaled by dinv.
    w1_p = jnp.zeros((in_c, hid_pad), jnp.float32).at[:, :hidden].set(w1)
    x_p = jnp.zeros((n_pad, in_c), jnp.float32).at[:n, :].set(x)
    y1 = (dinv * jnp.dot(x_p, w1_p)).astype(jnp.bfloat16)

    b1_p = jnp.zeros((1, hid_pad), jnp.float32).at[:, :hidden].set(b1.reshape(1, -1))
    b2_p = jnp.zeros((1, out_pad), jnp.float32).at[:, :out_c].set(b2.reshape(1, -1))
    w2_p = jnp.zeros((hid_pad, out_pad), jnp.bfloat16).at[:hidden, :out_c].set(
        w2.astype(jnp.bfloat16))

    # Layer 1 (fused W2 + layer-2 row pre-scale) -> bf16, then layer 2 -> f32.
    y2 = _layer1(adj, y1, dinv, b1_p, w2_p, tm, tk)
    out = _layer2(adj, y2, dinv, b2_p, tm, tk)
    return out[:n, :out_c]


# ------------------------------------ main ------------------------------------
if __name__ == "__main__":
    key = jax.random.PRNGKey(0)
    num_nodes = 8
    in_channels, hidden_channels, out_channels = 4, 32, 4
    k_x, k_w1, k_b1, k_w2, k_b2 = jax.random.split(key, 5)

    x = jax.random.normal(k_x, (num_nodes, in_channels), jnp.float32)

    # Deterministic bidirectional ring graph, edge_index shape [2, E].
    src = jnp.arange(num_nodes, dtype=jnp.int32)
    dst = (src + 1) % num_nodes
    edge_index = jnp.stack(
        [jnp.concatenate([src, dst]), jnp.concatenate([dst, src])], axis=0
    )

    w1 = jax.random.normal(k_w1, (in_channels, hidden_channels), jnp.float32) * (
        1.0 / jnp.sqrt(in_channels)
    )
    b1 = jax.random.normal(k_b1, (hidden_channels,), jnp.float32) * 0.01
    w2 = jax.random.normal(k_w2, (hidden_channels, out_channels), jnp.float32) * (
        1.0 / jnp.sqrt(hidden_channels)
    )
    b2 = jax.random.normal(k_b2, (out_channels,), jnp.float32) * 0.01

    out = jax.jit(gcn_forward)(x, edge_index, w1, b1, w2, b2)
    out = jax.block_until_ready(out)

    # Pure-JAX f32 reference (PyG GCNConv semantics).
    a = jnp.zeros((num_nodes, num_nodes), jnp.float32).at[
        edge_index[1], edge_index[0]
    ].add(1.0) + jnp.eye(num_nodes, dtype=jnp.float32)
    deg_ref = a.sum(axis=1)
    dinv_ref = jnp.where(deg_ref > 0, 1.0 / jnp.sqrt(deg_ref), 0.0)
    a_norm = dinv_ref[:, None] * a * dinv_ref[None, :]
    ref_h = jnp.maximum(a_norm @ (x @ w1) + b1[None, :], 0.0)
    ref = a_norm @ (ref_h @ w2) + b2[None, :]

    assert out.shape == (num_nodes, out_channels)
    max_err = float(jnp.max(jnp.abs(out - ref)))
    assert jnp.allclose(out, ref, atol=3e-2, rtol=3e-2), max_err

    print("KERNEL_OK")
</pallas_src>

<mosaic_0001>
module attributes {stable_mosaic.version = 11 : i64} {
  func.func private @main(%arg0: i32) attributes {dimension_semantics = [#tpu.dimension_semantics<core_parallel>], iteration_bounds = array<i64: 2>, tpu.core_type = #tpu.core_type<sc_scalar_subcore>, window_params = []} {
    return
  }
}

module attributes {stable_mosaic.version = 11 : i64} {
  func.func private @main(%arg0: i32) attributes {dimension_semantics = [#tpu.dimension_semantics<core_parallel>], iteration_bounds = array<i64: 2>, tpu.core_type = #tpu.core_type<sc_scalar_subcore>, window_params = []} {
    return
  }
}

module attributes {stable_mosaic.version = 11 : i64} {
  func.func @_layer1_kernel(%arg0: i32, %arg1: i32, %arg2: memref<256x256xi8, #tpu.memory_space<vmem>>, %arg3: memref<256x128xbf16, #tpu.memory_space<vmem>>, %arg4: memref<256x1xf32, #tpu.memory_space<vmem>>, %arg5: memref<1x128xf32, #tpu.memory_space<vmem>>, %arg6: memref<128x128xbf16, #tpu.memory_space<vmem>>, %arg7: memref<256x128xbf16, #tpu.memory_space<vmem>>, %arg8: memref<256x128xf32, #tpu.memory_space<vmem>>) attributes {dimension_semantics = [#tpu.dimension_semantics<parallel>, #tpu.dimension_semantics<arbitrary>], iteration_bounds = array<i64: 1, 1>, scalar_prefetch = 0 : i64, scratch_operands = 1 : i64, tpu.core_type = #tpu.core_type<tc>, window_params = [{transform_indices = @transform_0, window_bounds = array<i64: 256, 256>}, {transform_indices = @transform_1, window_bounds = array<i64: 256, 128>}, {transform_indices = @transform_2, window_bounds = array<i64: 256, 1>}, {pipeline_mode = #tpu.pipeline_mode<synchronous>, transform_indices = @transform_3, window_bounds = array<i64: 1, 128>}, {pipeline_mode = #tpu.pipeline_mode<synchronous>, transform_indices = @transform_4, window_bounds = array<i64: 128, 128>}, {transform_indices = @transform_5, window_bounds = array<i64: 256, 128>}]} {
    %c0_i32 = arith.constant 0 : i32
    %0 = arith.cmpi eq, %arg1, %c0_i32 : i32
    %1 = arith.extui %0 : i1 to i32
    %c0_i32_0 = arith.constant 0 : i32
    %2 = arith.cmpi ne, %1, %c0_i32_0 : i32
    scf.if %2 {
      %cst_10 = arith.constant 0.000000e+00 : f32
      %13 = vector.broadcast %cst_10 : f32 to vector<256x128xf32>
      %c0_11 = arith.constant 0 : index
      %c0_12 = arith.constant 0 : index
      %14 = vector.load %arg8[%c0_11, %c0_12] : memref<256x128xf32, #tpu.memory_space<vmem>>, vector<256x128xf32>
      tpu.vector_store %arg8[%c0_11, %c0_12], %13 {strides = array<i32>} : memref<256x128xf32, #tpu.memory_space<vmem>>, vector<256x128xf32>,
    } else {
    }
    %c0 = arith.constant 0 : index
    %c0_1 = arith.constant 0 : index
    %3 = vector.load %arg8[%c0, %c0_1] : memref<256x128xf32, #tpu.memory_space<vmem>>, vector<256x128xf32>
    %c0_2 = arith.constant 0 : index
    %c0_3 = arith.constant 0 : index
    %4 = vector.load %arg2[%c0_2, %c0_3] : memref<256x256xi8, #tpu.memory_space<vmem>>, vector<256x256xi8>
    %5 = arith.sitofp %4 : vector<256x256xi8> to vector<256x256xbf16>
    %c0_4 = arith.constant 0 : index
    %c0_5 = arith.constant 0 : index
    %6 = vector.load %arg3[%c0_4, %c0_5] : memref<256x128xbf16, #tpu.memory_space<vmem>>, vector<256x128xbf16>
    %cst = arith.constant dense<0.000000e+00> : vector<256x128xf32>
    %7 = tpu.matmul %5, %6, %cst {dimension_numbers = #tpu.dot_dimension_numbers<[1], [0], [0], [1], [0, 0, 1, 1], [], []>} : vector<256x256xbf16>, vector<256x128xbf16>, vector<256x128xf32> -> vector<256x128xf32>
    %8 = arith.addf %3, %7 : vector<256x128xf32>
    %c0_6 = arith.constant 0 : index
    %c0_7 = arith.constant 0 : index
    %9 = vector.load %arg8[%c0_6, %c0_7] : memref<256x128xf32, #tpu.memory_space<vmem>>, vector<256x128xf32>
    tpu.vector_store %arg8[%c0_6, %c0_7], %8 {strides = array<i32>} : memref<256x128xf32, #tpu.memory_space<vmem>>, vector<256x128xf32>,
    %c0_i32_8 = arith.constant 0 : i32
    %10 = arith.cmpi eq, %arg1, %c0_i32_8 : i32
    %11 = arith.extui %10 : i1 to i32
    %c0_i32_9 = arith.constant 0 : i32
    %12 = arith.cmpi ne, %11, %c0_i32_9 : i32
    scf.if %12 {
      %c0_10 = arith.constant 0 : index
      %c0_11 = arith.constant 0 : index
      %13 = vector.load %arg4[%c0_10, %c0_11] : memref<256x1xf32, #tpu.memory_space<vmem>>, vector<256x1xf32>
      %c0_12 = arith.constant 0 : index
      %c0_13 = arith.constant 0 : index
      %14 = vector.load %arg8[%c0_12, %c0_13] : memref<256x128xf32, #tpu.memory_space<vmem>>, vector<256x128xf32>
      %15 = vector.broadcast %13 : vector<256x1xf32> to vector<256x128xf32>
      %16 = arith.mulf %15, %14 : vector<256x128xf32>
      %c0_14 = arith.constant 0 : index
      %c0_15 = arith.constant 0 : index
      %17 = vector.load %arg5[%c0_14, %c0_15] : memref<1x128xf32, #tpu.memory_space<vmem>>, vector<1x128xf32>
      %18 = vector.broadcast %17 : vector<1x128xf32> to vector<256x128xf32>
      %19 = arith.addf %16, %18 : vector<256x128xf32>
      %cst_16 = arith.constant 0.000000e+00 : f32
      %20 = vector.broadcast %cst_16 : f32 to vector<256x128xf32>
      %21 = arith.maximumf %19, %20 : vector<256x128xf32>
      %22 = arith.truncf %21 : vector<256x128xf32> to vector<256x128xbf16>
      %c0_17 = arith.constant 0 : index
      %c0_18 = arith.constant 0 : index
      %23 = vector.load %arg6[%c0_17, %c0_18] : memref<128x128xbf16, #tpu.memory_space<vmem>>, vector<128x128xbf16>
      %cst_19 = arith.constant dense<0.000000e+00> : vector<256x128xf32>
      %24 = tpu.matmul %22, %23, %cst_19 {dimension_numbers = #tpu.dot_dimension_numbers<[1], [0], [0], [1], [0, 0, 1, 1], [], []>} : vector<256x128xbf16>, vector<128x128xbf16>, vector<256x128xf32> -> vector<256x128xf32>
      %25 = vector.broadcast %13 : vector<256x1xf32> to vector<256x128xf32>
      %26 = arith.mulf %25, %24 : vector<256x128xf32>
      %27 = arith.truncf %26 : vector<256x128xf32> to vector<256x128xbf16>
      %c0_20 = arith.constant 0 : index
      %c0_21 = arith.constant 0 : index
      %28 = vector.load %arg7[%c0_20, %c0_21] : memref<256x128xbf16, #tpu.memory_space<vmem>>, vector<256x128xbf16>
      tpu.vector_store %arg7[%c0_20, %c0_21], %27 {strides = array<i32>} : memref<256x128xbf16, #tpu.memory_space<vmem>>, vector<256x128xbf16>,
    } else {
    }
    return
  }
  func.func @transform_0(%arg0: i32, %arg1: i32) -> (i32, i32) {
    %c0_i32 = arith.constant 0 : i32
    return %arg0, %arg1 : i32, i32
  }
  func.func @transform_1(%arg0: i32, %arg1: i32) -> (i32, i32) {
    %c0_i32 = arith.constant 0 : i32
    %c0_i32_0 = arith.constant 0 : i32
    return %arg1, %c0_i32 : i32, i32
  }
  func.func @transform_2(%arg0: i32, %arg1: i32) -> (i32, i32) {
    %c0_i32 = arith.constant 0 : i32
    %c0_i32_0 = arith.constant 0 : i32
    return %arg0, %c0_i32 : i32, i32
  }
  func.func @transform_3(%arg0: i32, %arg1: i32) -> (i32, i32) {
    %c0_i32 = arith.constant 0 : i32
    %c0_i32_0 = arith.constant 0 : i32
    %c0_i32_1 = arith.constant 0 : i32
    return %c0_i32, %c0_i32_0 : i32, i32
  }
  func.func @transform_4(%arg0: i32, %arg1: i32) -> (i32, i32) {
    %c0_i32 = arith.constant 0 : i32
    %c0_i32_0 = arith.constant 0 : i32
    %c0_i32_1 = arith.constant 0 : i32
    return %c0_i32, %c0_i32_0 : i32, i32
  }
  func.func @transform_5(%arg0: i32, %arg1: i32) -> (i32, i32) {
    %c0_i32 = arith.constant 0 : i32
    %c0_i32_0 = arith.constant 0 : i32
    return %arg0, %c0_i32 : i32, i32
  }
}

module attributes {stable_mosaic.version = 11 : i64} {
  func.func @_layer2_kernel(%arg0: i32, %arg1: i32, %arg2: memref<256x256xi8, #tpu.memory_space<vmem>>, %arg3: memref<256x128xbf16, #tpu.memory_space<vmem>>, %arg4: memref<256x1xf32, #tpu.memory_space<vmem>>, %arg5: memref<1x128xf32, #tpu.memory_space<vmem>>, %arg6: memref<256x128xf32, #tpu.memory_space<vmem>>) attributes {dimension_semantics = [#tpu.dimension_semantics<parallel>, #tpu.dimension_semantics<arbitrary>], iteration_bounds = array<i64: 1, 1>, scalar_prefetch = 0 : i64, scratch_operands = 0 : i64, tpu.core_type = #tpu.core_type<tc>, window_params = [{transform_indices = @transform_0, window_bounds = array<i64: 256, 256>}, {transform_indices = @transform_1, window_bounds = array<i64: 256, 128>}, {transform_indices = @transform_2, window_bounds = array<i64: 256, 1>}, {pipeline_mode = #tpu.pipeline_mode<synchronous>, transform_indices = @transform_3, window_bounds = array<i64: 1, 128>}, {transform_indices = @transform_4, window_bounds = array<i64: 256, 128>}]} {
    %c0_i32 = arith.constant 0 : i32
    %0 = arith.cmpi eq, %arg1, %c0_i32 : i32
    %1 = arith.extui %0 : i1 to i32
    %c0_i32_0 = arith.constant 0 : i32
    %2 = arith.cmpi ne, %1, %c0_i32_0 : i32
    scf.if %2 {
      %cst_10 = arith.constant 0.000000e+00 : f32
      %13 = vector.broadcast %cst_10 : f32 to vector<256x128xf32>
      %c0_11 = arith.constant 0 : index
      %c0_12 = arith.constant 0 : index
      %14 = vector.load %arg6[%c0_11, %c0_12] : memref<256x128xf32, #tpu.memory_space<vmem>>, vector<256x128xf32>
      tpu.vector_store %arg6[%c0_11, %c0_12], %13 {strides = array<i32>} : memref<256x128xf32, #tpu.memory_space<vmem>>, vector<256x128xf32>,
    } else {
    }
    %c0 = arith.constant 0 : index
    %c0_1 = arith.constant 0 : index
    %3 = vector.load %arg6[%c0, %c0_1] : memref<256x128xf32, #tpu.memory_space<vmem>>, vector<256x128xf32>
    %c0_2 = arith.constant 0 : index
    %c0_3 = arith.constant 0 : index
    %4 = vector.load %arg2[%c0_2, %c0_3] : memref<256x256xi8, #tpu.memory_space<vmem>>, vector<256x256xi8>
    %5 = arith.sitofp %4 : vector<256x256xi8> to vector<256x256xbf16>
    %c0_4 = arith.constant 0 : index
    %c0_5 = arith.constant 0 : index
    %6 = vector.load %arg3[%c0_4, %c0_5] : memref<256x128xbf16, #tpu.memory_space<vmem>>, vector<256x128xbf16>
    %cst = arith.constant dense<0.000000e+00> : vector<256x128xf32>
    %7 = tpu.matmul %5, %6, %cst {dimension_numbers = #tpu.dot_dimension_numbers<[1], [0], [0], [1], [0, 0, 1, 1], [], []>} : vector<256x256xbf16>, vector<256x128xbf16>, vector<256x128xf32> -> vector<256x128xf32>
    %8 = arith.addf %3, %7 : vector<256x128xf32>
    %c0_6 = arith.constant 0 : index
    %c0_7 = arith.constant 0 : index
    %9 = vector.load %arg6[%c0_6, %c0_7] : memref<256x128xf32, #tpu.memory_space<vmem>>, vector<256x128xf32>
    tpu.vector_store %arg6[%c0_6, %c0_7], %8 {strides = array<i32>} : memref<256x128xf32, #tpu.memory_space<vmem>>, vector<256x128xf32>,
    %c0_i32_8 = arith.constant 0 : i32
    %10 = arith.cmpi eq, %arg1, %c0_i32_8 : i32
    %11 = arith.extui %10 : i1 to i32
    %c0_i32_9 = arith.constant 0 : i32
    %12 = arith.cmpi ne, %11, %c0_i32_9 : i32
    scf.if %12 {
      %c0_10 = arith.constant 0 : index
      %c0_11 = arith.constant 0 : index
      %13 = vector.load %arg4[%c0_10, %c0_11] : memref<256x1xf32, #tpu.memory_space<vmem>>, vector<256x1xf32>
      %c0_12 = arith.constant 0 : index
      %c0_13 = arith.constant 0 : index
      %14 = vector.load %arg6[%c0_12, %c0_13] : memref<256x128xf32, #tpu.memory_space<vmem>>, vector<256x128xf32>
      %15 = vector.broadcast %13 : vector<256x1xf32> to vector<256x128xf32>
      %16 = arith.mulf %15, %14 : vector<256x128xf32>
      %c0_14 = arith.constant 0 : index
      %c0_15 = arith.constant 0 : index
      %17 = vector.load %arg5[%c0_14, %c0_15] : memref<1x128xf32, #tpu.memory_space<vmem>>, vector<1x128xf32>
      %18 = vector.broadcast %17 : vector<1x128xf32> to vector<256x128xf32>
      %19 = arith.addf %16, %18 : vector<256x128xf32>
      %c0_16 = arith.constant 0 : index
      %c0_17 = arith.constant 0 : index
      %20 = vector.load %arg6[%c0_16, %c0_17] : memref<256x128xf32, #tpu.memory_space<vmem>>, vector<256x128xf32>
      tpu.vector_store %arg6[%c0_16, %c0_17], %19 {strides = array<i32>} : memref<256x128xf32, #tpu.memory_space<vmem>>, vector<256x128xf32>,
    } else {
    }
    return
  }
  func.func @transform_0(%arg0: i32, %arg1: i32) -> (i32, i32) {
    %c0_i32 = arith.constant 0 : i32
    return %arg0, %arg1 : i32, i32
  }
  func.func @transform_1(%arg0: i32, %arg1: i32) -> (i32, i32) {
    %c0_i32 = arith.constant 0 : i32
    %c0_i32_0 = arith.constant 0 : i32
    return %arg1, %c0_i32 : i32, i32
  }
  func.func @transform_2(%arg0: i32, %arg1: i32) -> (i32, i32) {
    %c0_i32 = arith.constant 0 : i32
    %c0_i32_0 = arith.constant 0 : i32
    return %arg0, %c0_i32 : i32, i32
  }
  func.func @transform_3(%arg0: i32, %arg1: i32) -> (i32, i32) {
    %c0_i32 = arith.constant 0 : i32
    %c0_i32_0 = arith.constant 0 : i32
    %c0_i32_1 = arith.constant 0 : i32
    return %c0_i32, %c0_i32_0 : i32, i32
  }
  func.func @transform_4(%arg0: i32, %arg1: i32) -> (i32, i32) {
    %c0_i32 = arith.constant 0 : i32
    %c0_i32_0 = arith.constant 0 : i32
    return %arg0, %c0_i32 : i32, i32
  }
}

</mosaic_0001>

<bundles_post_ra>
// kernel: gcn_forward.2
= control target key start
LH: loop header
LB: loop body
LE: loop exit
PB: predicated region body
PF: predicated region fallthrough
CT: control target
= control target key end

     0   :  { %v1876_v1 = vmov 0   ;;  %s2348_s1 = inlined_call_operand.vmem [shape: bf16[256,128], index: 1, kind: input, shape index: {}]   ;;  %s2349_s0 = inlined_call_operand.vmem [shape: s8[256,256], index: 0, kind: input, shape index: {}]   ;;  %s2350_s2 = inlined_call_operand.vmem [shape: f32[256,1], index: 2, kind: input, shape index: {}]   ;;  %s2351_s4 = inlined_call_operand.vmem [shape: bf16[128,128], index: 4, kind: input, shape index: {}]   ;;  %s2352_s3 = inlined_call_operand.vmem [shape: f32[1,128], index: 3, kind: input, shape index: {}]   ;;  %s2353_s5 = inlined_call_operand.vmem [shape: bf16[256,128], index: 5, kind: output, shape index: {}]  }
   0x1   :  { %v1852_v0 = vld [vmem:[%s2348_s1 + $0x40] sm:$0xff]   ;;  %1851 = vset.pattern.permute.xlu1 %v1876_v1  ;;  %1850 = vset.pattern.permute.xlu0 %v1876_v1  ;;  %v1854_v3 = vld [vmem:[%s2348_s1 + $0x48] sm:$0xff]   ;;  %v1856_v5 = vld [vmem:[%s2348_s1 + $0x50] sm:$0xff]  }
   0x2   :  { %v1853_v2 = vld [vmem:[%s2348_s1] sm:$0xff]   ;;  %1649 = vmatprep.subr.bf16.mxu0 %v1852_v0  ;;  %1833 = vmatprep.subr.bf16.mxu1 %v1852_v0  ;;  %v1855_v4 = vld [vmem:[%s2348_s1 + $0x8] sm:$0xff]   ;;  %v1857_v6 = vld [vmem:[%s2348_s1 + $0x10] sm:$0xff]  }
   0x3   :  { %1650 = vmatpush3.bf16.msra.mxu0 %v1853_v2  ;;  %1841 = vmatpush3.bf16.msra.mxu1 %v1853_v2  ;;  %v1858_v7 = vld [vmem:[%s2348_s1 + $0x58] sm:$0xff]   ;;  %v1860_v9 = vld [vmem:[%s2348_s1 + $0x60] sm:$0xff]   ;;  %v1862_v11 = vld [vmem:[%s2348_s1 + $0x68] sm:$0xff]  }
   0x4   :  { %1651 = vmatprep.subr.bf16.mxu0 %v1854_v3  ;;  %1834 = vmatprep.subr.bf16.mxu1 %v1854_v3  ;;  %v1859_v8 = vld [vmem:[%s2348_s1 + $0x18] sm:$0xff]   ;;  %v1861_v10 = vld [vmem:[%s2348_s1 + $0x20] sm:$0xff]   ;;  %v1863_v18 = vld [vmem:[%s2348_s1 + $0x28] sm:$0xff]  }
   0x5   :  { %v89_v12 = vld [vmem:[%s2349_s0] sm:$0xff]   ;;  %v1864_v20 = vld [vmem:[%s2348_s1 + $0x70] sm:$0xff]   ;;  %v672_v24 = vld [vmem:[%s2350_s2 + $0x18] sm:$0xff] }
   0x6   :  { %v121_v13 = vunpack.c.l.s8.bf16 %v89_v12  ;;  %v122_v14 = vunpack.c.h.s8.bf16 %v89_v12  ;;  %v113_v15 = vld [vmem:[%s2349_s0 + $0x60] sm:$0xff]   ;;  %v671_v21 = vld [vmem:[%s2350_s2 + $0x10] sm:$0xff]  ;;  %v670_v26 = vld [vmem:[%s2350_s2 + $0x8] sm:$0xff] }
   0x7   :  { %1652 = vmatpush3.bf16.msra.mxu0 %v1855_v4  ;;  %1842 = vmatpush3.bf16.msra.mxu1 %v1855_v4  ;;  %v145_v16 = vunpack.c.l.s8.bf16 %v113_v15  ;;  %v146_v17 = vunpack.c.h.s8.bf16 %v113_v15  ;;  %v669_v23 = vld [vmem:[%s2350_s2] sm:$0xff]  ;;  %v1865_v25 = vld [vmem:[%s2348_s1 + $0x30] sm:$0xff]   ;;  %v1866_v27 = vld [vmem:[%s2348_s1 + $0x78] sm:$0xff]  }
   0x8   :  { %1653 = vmatprep.subr.bf16.mxu0 %v1856_v5  ;;  %1835 = vmatprep.subr.bf16.mxu1 %v1856_v5  ;;  %v1434_v19 = vcombine.high %v121_v13, %v122_v14  ;;  %v91_v28 = vld [vmem:[%s2349_s0 + $0x8] sm:$0xff]   ;;  %v1867_v31 = vld [vmem:[%s2348_s1 + $0x38] sm:$0xff]   ;;  %v673_v36 = vld [vmem:[%s2350_s2 + $0x20] sm:$0xff]  ;;  %v1433_v37 = vcombine.low %v121_v13, %v122_v14 }
   0x9   :  { %v1458_v22 = vcombine.high %v145_v16, %v146_v17  ;;  %745 = vperm.xlu1 %1851, %v671_v21   ;;  %735 = vperm.xlu0 %1850, %v669_v23   ;;  %v115_v29 = vld [vmem:[%s2349_s0 + $0x68] sm:$0xff]   ;;  %v123_v32 = vunpack.c.l.s8.bf16 %v91_v28  ;;  %v124_v33 = vunpack.c.h.s8.bf16 %v91_v28  ;;  %v1457_v38 = vcombine.low %v145_v16, %v146_v17  ;;  %v676_v39 = vld [vmem:[%s2350_s2 + $0x38] sm:$0xff]  ;;  %v93_v41 = vld [vmem:[%s2349_s0 + $0x10] sm:$0xff]  }
   0xa   :  { %473 = vmatprep.mubr.bf16.mxu0 %v1434_v19  ;;  %v674_v30 = vld [vmem:[%s2350_s2 + $0x28] sm:$0xff]  ;;  %v147_v34 = vunpack.c.l.s8.bf16 %v115_v29  ;;  %v148_v35 = vunpack.c.h.s8.bf16 %v115_v29  ;;  %v117_v43 = vld [vmem:[%s2349_s0 + $0x70] sm:$0xff]   ;;  %v1868_v45 = vld [vmem:[%s2351_s4] sm:$0xff]   ;;  %v125_v48 = vunpack.c.l.s8.bf16 %v93_v41  ;;  %v126_v49 = vunpack.c.h.s8.bf16 %v93_v41 }
   0xb   :  { %1654 = vmatpush3.bf16.msra.mxu0 %v1857_v6  ;;  %1843 = vmatpush3.bf16.msra.mxu1 %v1857_v6  ;;  %v1436_v40 = vcombine.high %v123_v32, %v124_v33  ;;  %v675_v44 = vld [vmem:[%s2350_s2 + $0x30] sm:$0xff]  ;;  %v678_v46 = vld [vmem:[%s2350_s2 + $0x48] sm:$0xff]  ;;  %v149_v50 = vunpack.c.l.s8.bf16 %v117_v43  ;;  %v150_v51 = vunpack.c.h.s8.bf16 %v117_v43  ;;  %v677_v52 = vld [vmem:[%s2350_s2 + $0x40] sm:$0xff]  ;;  %v1435_v53 = vcombine.low %v123_v32, %v124_v33 }
   0xc   :  { %1655 = vmatprep.subr.bf16.mxu0 %v1858_v7  ;;  %1836 = vmatprep.subr.bf16.mxu1 %v1858_v7  ;;  %v1460_v42 = vcombine.high %v147_v34, %v148_v35  ;;  %v1869_v47 = vld [vmem:[%s2351_s4 + $0x8] sm:$0xff]   ;;  %v1459_v54 = vcombine.low %v147_v34, %v148_v35  ;;  %v680_v55 = vld [vmem:[%s2350_s2 + $0x58] sm:$0xff]  ;;  %v1438_v56 = vcombine.high %v125_v48, %v126_v49  ;;  %v1870_v60 = vld [vmem:[%s2351_s4 + $0x10] sm:$0xff]  }
   0xd   :  { %569 = vmatprep.mubr.bf16.mxu1 %v1458_v22  ;;  %750 = vperm.xlu1 %1851, %v672_v24   ;;  %v1462_v57 = vcombine.high %v149_v50, %v150_v51  ;;  %v95_v58 = vld [vmem:[%s2349_s0 + $0x18] sm:$0xff]   ;;  %v679_v61 = vld [vmem:[%s2350_s2 + $0x50] sm:$0xff]  ;;  %v682_v62 = vld [vmem:[%s2350_s2 + $0x68] sm:$0xff]  ;;  %v1437_v4 = vcombine.low %v125_v48, %v126_v49  ;;  %v1461_v5 = vcombine.low %v149_v50, %v150_v51 }
   0xe   :  { %740 = vperm.xlu0 %1850, %v670_v26   ;;  %v119_v59 = vld [vmem:[%s2349_s0 + $0x78] sm:$0xff]   ;;  %v127_v63 = vunpack.c.l.s8.bf16 %v95_v58  ;;  %v128_v0 = vunpack.c.h.s8.bf16 %v95_v58  ;;  %v681_v3 = vld [vmem:[%s2350_s2 + $0x60] sm:$0xff]  ;;  %v99_v19 = vld [vmem:[%s2349_s0 + $0x28] sm:$0xff]  }
   0xf   :  { %1656 = vmatpush3.bf16.msra.mxu0 %v1859_v8  ;;  %1844 = vmatpush3.bf16.msra.mxu1 %v1859_v8  ;;  %v151_v1 = vunpack.c.l.s8.bf16 %v119_v59  ;;  %v152_v2 = vunpack.c.h.s8.bf16 %v119_v59  ;;  %v684_v6 = vld [vmem:[%s2350_s2 + $0x78] sm:$0xff]  ;;  %v685_v14 = vld [vmem:[%s2350_s2 + $0x80] sm:$0xff]  ;;  %v690_v21 = vld [vmem:[%s2350_s2 + $0xa8] sm:$0xff]  ;;  %v131_v22 = vunpack.c.l.s8.bf16 %v99_v19  ;;  %v132_v23 = vunpack.c.h.s8.bf16 %v99_v19 }
  0x10   :  { %1657 = vmatprep.subr.bf16.mxu0 %v1860_v9  ;;  %1837 = vmatprep.subr.bf16.mxu1 %v1860_v9  ;;  %v1440_v7 = vcombine.high %v127_v63, %v128_v0  ;;  %v97_v9 = vld [vmem:[%s2349_s0 + $0x20] sm:$0xff]   ;;  %v1439_v15 = vcombine.low %v127_v63, %v128_v0  ;;  %v688_v17 = vld [vmem:[%s2350_s2 + $0x98] sm:$0xff]  ;;  %v101_v28 = vld [vmem:[%s2349_s0 + $0x30] sm:$0xff]  }
  0x11   :  { %760 = vperm.xlu1 %1851, %v674_v30   ;;  %v1464_v8 = vcombine.high %v151_v1, %v152_v2  ;;  %v129_v12 = vunpack.c.l.s8.bf16 %v97_v9  ;;  %v130_v13 = vunpack.c.h.s8.bf16 %v97_v9  ;;  %v1463_v16 = vcombine.low %v151_v1, %v152_v2  ;;  %v689_v24 = vld [vmem:[%s2350_s2 + $0xa0] sm:$0xff]  ;;  %v692_v26 = vld [vmem:[%s2350_s2 + $0xb8] sm:$0xff]  ;;  %v691_v29 = vld [vmem:[%s2350_s2 + $0xb0] sm:$0xff] }
  0x12   :  { %755 = vperm.xlu0 %1850, %v673_v36   ;;  %v694_v30 = vld [vmem:[%s2350_s2 + $0xc8] sm:$0xff]  ;;  %v134_v32 = vunpack.c.h.s8.bf16 %v101_v28  ;;  %v693_v33 = vld [vmem:[%s2350_s2 + $0xc0] sm:$0xff]  ;;  %v1443_v34 = vcombine.low %v131_v22, %v132_v23  ;;  %v696_v35 = vld [vmem:[%s2350_s2 + $0xd8] sm:$0xff] }
  0x13   :  { %1658 = vmatpush3.bf16.msra.mxu0 %v1861_v10  ;;  %1845 = vmatpush3.bf16.msra.mxu1 %v1861_v10  ;;  %v683_v10 = vld [vmem:[%s2350_s2 + $0x70] sm:$0xff] }
  0x14   :  { %1659 = vmatprep.subr.bf16.mxu0 %v1862_v11  ;;  %1838 = vmatprep.subr.bf16.mxu1 %v1862_v11  ;;  %v686_v11 = vld [vmem:[%s2350_s2 + $0x88] sm:$0xff] }
  0x15   :  { %770 = vperm.xlu1 %1851, %v676_v39   ;;  %v698_v39 = vld [vmem:[%s2350_s2 + $0xe8] sm:$0xff] }
  0x16   :  { %765 = vperm.xlu0 %1850, %v675_v44   ;;  %v700_v44 = vld [vmem:[%s2350_s2 + $0xf8] sm:$0xff] }
  0x17   :  { %1660 = vmatpush3.bf16.msra.mxu0 %v1863_v18  ;;  %1846 = vmatpush3.bf16.msra.mxu1 %v1863_v18  ;;  %v1442_v18 = vcombine.high %v129_v12, %v130_v13 }
  0x18   :  { %1661 = vmatprep.subr.bf16.mxu0 %v1864_v20  ;;  %1839 = vmatprep.subr.bf16.mxu1 %v1864_v20  ;;  %v687_v20 = vld [vmem:[%s2350_s2 + $0x90] sm:$0xff] }
  0x19   :  { %780 = vperm.xlu1 %1851, %v678_v46   ;;  %v105_v46 = vld [vmem:[%s2349_s0 + $0x40] sm:$0xff]  }
  0x1a   :  { %775 = vperm.xlu0 %1850, %v677_v52   ;;  %v137_v48 = vunpack.c.l.s8.bf16 %v105_v46  ;;  %v138_v49 = vunpack.c.h.s8.bf16 %v105_v46  ;;  %v107_v52 = vld [vmem:[%s2349_s0 + $0x48] sm:$0xff]  }
  0x1b   :  { %1662 = vmatpush3.bf16.msra.mxu0 %v1865_v25  ;;  %1847 = vmatpush3.bf16.msra.mxu1 %v1865_v25  ;;  %v1441_v25 = vcombine.low %v129_v12, %v130_v13 }
  0x1c   :  { %1663 = vmatprep.subr.bf16.mxu0 %v1866_v27  ;;  %1840 = vmatprep.subr.bf16.mxu1 %v1866_v27  ;;  %v1444_v27 = vcombine.high %v131_v22, %v132_v23  ;;  %v1450_v51 = vcombine.high %v137_v48, %v138_v49 }
  0x1d   :  { %790 = vperm.xlu1 %1851, %v680_v55   ;;  %v1449_v55 = vcombine.low %v137_v48, %v138_v49 }
  0x1e   :  { %785 = vperm.xlu0 %1850, %v679_v61  }
  0x1f   :  { %1664 = vmatpush3.bf16.msra.mxu0 %v1867_v31  ;;  %1848 = vmatpush3.bf16.msra.mxu1 %v1867_v31  ;;  %v133_v31 = vunpack.c.l.s8.bf16 %v101_v28 }
  0x20   :  { %1785 = vmatprep.subr.bf16.mxu1 %v1868_v45 }
  0x21   :  { %800 = vperm.xlu1 %1851, %v682_v62   ;;  %v1446_v36 = vcombine.high %v133_v31, %v134_v32  ;;  %v1445_v43 = vcombine.low %v133_v31, %v134_v32  ;;  %v111_v62 = vld [vmem:[%s2349_s0 + $0x58] sm:$0xff]  }
  0x22   :  { %474 = vmatmul.mubr.bf16.vlgmr.msra.gmra.mrb[0].mxu0 %v1433_v37  ;;  %570 = vmatmul.mubr.bf16.vlgmr.msra.gmra.mrb[0].mxu1 %v1457_v38  ;;  %v103_v37 = vld [vmem:[%s2349_s0 + $0x38] sm:$0xff]   ;;  %v695_v38 = vld [vmem:[%s2350_s2 + $0xd0] sm:$0xff]  ;;  %v143_v63 = vunpack.c.l.s8.bf16 %v111_v62  ;;  %v144_v0 = vunpack.c.h.s8.bf16 %v111_v62 }
  0x23   :  { %481 = vmatprep.mubr.bf16.mxu0 %v1436_v40  ;;  %577 = vmatprep.mubr.bf16.mxu1 %v1460_v42  ;;  %v135_v40 = vunpack.c.l.s8.bf16 %v103_v37  ;;  %v136_v41 = vunpack.c.h.s8.bf16 %v103_v37  ;;  %v697_v42 = vld [vmem:[%s2350_s2 + $0xe0] sm:$0xff] }
  0x24   :  { %1786 = vmatpush3.bf16.msra.mxu1 %v1868_v45  ;;  %795 = vperm.xlu0 %1850, %v681_v3   ;;  %v1456_v2 = vcombine.high %v143_v63, %v144_v0  ;;  %v1871_v3 = vld [vmem:[%s2351_s4 + $0x18] sm:$0xff]  }
  0x25   :  { %1787 = vmatprep.subr.bf16.mxu1 %v1869_v47  ;;  %810 = vperm.xlu1 %1851, %v684_v6   ;;  %v1448_v45 = vcombine.high %v135_v40, %v136_v41  ;;  %v1447_v50 = vcombine.low %v135_v40, %v136_v41  ;;  %v1873_v6 = vld [vmem:[%s2351_s4 + $0x28] sm:$0xff]  }
  0x28   :  { %1788 = vmatpush3.bf16.msra.mxu1 %v1869_v47  ;;  %805 = vperm.xlu0 %1850, %v683_v10   ;;  %v699_v47 = vld [vmem:[%s2350_s2 + $0xf0] sm:$0xff] }
  0x29   :  { %1789 = vmatprep.subr.bf16.mxu1 %v1870_v60  ;;  %820 = vperm.xlu1 %1851, %v686_v11  }
  0x2a   :  { %482 = vmatmul.mubr.bf16.gmra.mrb[4].mxu0 %v1435_v53  ;;  %578 = vmatmul.mubr.bf16.gmra.mrb[4].mxu1 %v1459_v54  ;;  %v139_v53 = vunpack.c.l.s8.bf16 %v107_v52  ;;  %v140_v54 = vunpack.c.h.s8.bf16 %v107_v52 }
  0x2b   :  { %489 = vmatprep.mubr.bf16.mxu0 %v1438_v56  ;;  %585 = vmatprep.mubr.bf16.mxu1 %v1462_v57  ;;  %v109_v57 = vld [vmem:[%s2349_s0 + $0x50] sm:$0xff]  }
  0x2c   :  { %1790 = vmatpush3.bf16.msra.mxu1 %v1870_v60  ;;  %815 = vperm.xlu0 %1850, %v685_v14   ;;  %v1452_v56 = vcombine.high %v139_v53, %v140_v54  ;;  %v141_v58 = vunpack.c.l.s8.bf16 %v109_v57  ;;  %v142_v59 = vunpack.c.h.s8.bf16 %v109_v57  ;;  %v1451_v60 = vcombine.low %v139_v53, %v140_v54 }
  0x2d   :  { %830 = vperm.xlu1 %1851, %v688_v17   ;;  %1791 = vmatprep.subr.bf16.mxu1 %v1871_v3 }
  0x2e   :  { %v1454_v61 = vcombine.high %v141_v58, %v142_v59  ;;  %v1453_v1 = vcombine.low %v141_v58, %v142_v59 }
  0x30   :  { %825 = vperm.xlu0 %1850, %v687_v20   ;;  %1792 = vmatpush3.bf16.msra.mxu1 %v1871_v3 }
  0x31   :  { %840 = vperm.xlu1 %1851, %v690_v21  }
  0x32   :  { %490 = vmatmul.mubr.bf16.gmra.mrb[8].mxu0 %v1437_v4  ;;  %586 = vmatmul.mubr.bf16.gmra.mrb[8].mxu1 %v1461_v5  ;;  %v1455_v4 = vcombine.low %v143_v63, %v144_v0  ;;  %v1872_v5 = vld [vmem:[%s2351_s4 + $0x20] sm:$0xff]  }
  0x33   :  { %497 = vmatprep.mubr.bf16.mxu0 %v1440_v7  ;;  %593 = vmatprep.mubr.bf16.mxu1 %v1464_v8  ;;  %v1874_v7 = vld [vmem:[%s2351_s4 + $0x30] sm:$0xff]   ;;  %v1875_v8 = vld [vmem:[%s2351_s4 + $0x38] sm:$0xff]  }
  0x34   :  { %835 = vperm.xlu0 %1850, %v689_v24   ;;  %1793 = vmatprep.subr.bf16.mxu1 %v1872_v5 }
  0x35   :  { %850 = vperm.xlu1 %1851, %v692_v26   ;;  %1794 = vmatpush3.bf16.msra.mxu1 %v1872_v5 }
  0x36   :  { %1795 = vmatprep.subr.bf16.mxu1 %v1873_v6 }
  0x38   :  { %845 = vperm.xlu0 %1850, %v691_v29  }
  0x39   :  { %860 = vperm.xlu1 %1851, %v694_v30   ;;  %1796 = vmatpush3.bf16.msra.mxu1 %v1873_v6 }
  0x3a   :  { %498 = vmatmul.mubr.bf16.gmra.mrb[12].mxu0 %v1439_v15  ;;  %594 = vmatmul.mubr.bf16.gmra.mrb[12].mxu1 %v1463_v16 }
  0x3b   :  { %505 = vmatprep.mubr.bf16.mxu0 %v1442_v18  ;;  %1797 = vmatprep.subr.bf16.mxu1 %v1874_v7 }
  0x3c   :  { %855 = vperm.xlu0 %1850, %v693_v33  }
  0x3d   :  { %870 = vperm.xlu1 %1851, %v696_v35   ;;  %1798 = vmatpush3.bf16.msra.mxu1 %v1874_v7 }
  0x3e   :  { %1799 = vmatprep.subr.bf16.mxu1 %v1875_v8 }
  0x40   :  { %865 = vperm.xlu0 %1850, %v695_v38  }
  0x41   :  { %880 = vperm.xlu1 %1851, %v698_v39   ;;  %1800 = vmatpush3.bf16.msra.mxu1 %v1875_v8 }
  0x42   :  { %506 = vmatmul.mubr.bf16.gmra.mrb[16].mxu0 %v1441_v25 }
  0x43   :  { %513 = vmatprep.mubr.bf16.mxu0 %v1444_v27 }
  0x44   :  { %875 = vperm.xlu0 %1850, %v697_v42  }
  0x45   :  { %890 = vperm.xlu1 %1851, %v700_v44  }
  0x48   :  { %885 = vperm.xlu0 %1850, %v699_v47  }
  0x4a   :  { %514 = vmatmul.mubr.bf16.gmra.mrb[20].mxu0 %v1443_v34 }
  0x4b   :  { %521 = vmatprep.mubr.bf16.mxu0 %v1446_v36 }
  0x52   :  { %522 = vmatmul.mubr.bf16.gmra.mrb[24].mxu0 %v1445_v43  ;;  %v2178_v43 = vld [vmem:[%s2352_s3] ss:$0 sm:$0xff] }
  0x53   :  { %529 = vmatprep.mubr.bf16.mxu0 %v1448_v45 }
  0x5a   :  { %530 = vmatmul.mubr.bf16.gmra.mrb[28].mxu0 %v1447_v50 }
  0x5b   :  { %537 = vmatprep.mubr.bf16.mxu0 %v1450_v51 }
  0x62   :  { %538 = vmatmul.mubr.bf16.gmra.mrb[32].mxu0 %v1449_v55 }
  0x63   :  { %545 = vmatprep.mubr.bf16.mxu0 %v1452_v56 }
  0x6a   :  { %546 = vmatmul.mubr.bf16.gmra.mrb[36].mxu0 %v1451_v60 }
  0x6b   :  { %553 = vmatprep.mubr.bf16.mxu0 %v1454_v61 }
  0x72   :  { %554 = vmatmul.mubr.bf16.gmra.mrb[40].mxu0 %v1453_v1 }
  0x73   :  { %561 = vmatprep.mubr.bf16.mxu0 %v1456_v2 }
  0x7a   :  { %562 = vmatmul.mubr.bf16.gmra.mrb[44].mxu0 %v1455_v4 }
  0x88   :  { %v2123_v9 = vpop.permute.xlu1 %745  ;;  %v2125_v10 = vpop.permute.xlu0 %735 }
  0x8c   :  { %v2127_v11 = vpop.permute.xlu1 %750 }
  0x8d   :  { %v2129_v12 = vpop.permute.xlu0 %740 }
  0x90   :  { %v2131_v13 = vpop.permute.xlu1 %760 }
  0x91   :  { %v2133_v14 = vpop.permute.xlu0 %755 }
  0x94   :  { %v2135_v15 = vpop.permute.xlu1 %770 }
  0x95   :  { %v2137_v16 = vpop.permute.xlu0 %765 }
  0x98   :  { %v2139_v17 = vpop.permute.xlu1 %780 }
  0x99   :  { %v2141_v18 = vpop.permute.xlu0 %775 }
  0x9c   :  { %v2143_v19 = vpop.permute.xlu1 %790 }
  0x9d   :  { %v2145_v20 = vpop.permute.xlu0 %785 }
  0xa0   :  { %v2147_v21 = vpop.permute.xlu1 %800 }
  0xa3   :  { %v2149_v22 = vpop.permute.xlu0 %795 }
  0xa4   :  { %v2151_v23 = vpop.permute.xlu1 %810 }
  0xa7   :  { %v2153_v24 = vpop.permute.xlu0 %805 }
  0xa8   :  { %v2155_v25 = vpop.permute.xlu1 %820 }
  0xab   :  { %v2157_v26 = vpop.permute.xlu0 %815 }
  0xac   :  { %v2159_v27 = vpop.permute.xlu1 %830 }
  0xaf   :  { %v2161_v28 = vpop.permute.xlu0 %825 }
  0xb0   :  { %v2163_v29 = vpop.permute.xlu1 %840 }
  0xb3   :  { %v2165_v30 = vpop.permute.xlu0 %835 }
  0xb4   :  { %v2167_v31 = vpop.permute.xlu1 %850 }
  0xb7   :  { %v2169_v32 = vpop.permute.xlu0 %845 }
  0xb8   :  { %v2171_v33 = vpop.permute.xlu1 %860 }
  0xbb   :  { %v2173_v34 = vpop.permute.xlu0 %855 }
  0xbc   :  { %v2186_v54 = vpop.permute.xlu1 %870 }
  0xbf   :  { %v2188_v55 = vpop.permute.xlu0 %865 }
  0xf5   :  { %v1665_v35 = vpop.f32.mrb[0].mxu0  ;;  %v1737_v36 = vpop.f32.mrb[0].mxu1 }
  0xf6   :  { %v1666_v37 = vpop.f32.mrb[1].mxu0  ;;  %v1738_v38 = vpop.f32.mrb[1].mxu1 }
  0xf7   :  { %v1667_v39 = vadd.f32 %v1666_v37, %v1665_v35  ;;  %v1668_v40 = vpop.f32.mrb[2].mxu0  ;;  %v1739_v41 = vadd.f32 %v1738_v38, %v1737_v36  ;;  %v1740_v42 = vpop.f32.mrb[2].mxu1 }
  0xf8   :  { %v1669_v44 = vpop.f32.mrb[3].mxu0  ;;  %v1741_v45 = vpop.f32.mrb[3].mxu1 }
  0xf9   :  { %v893_v46 = vmul.f32 %v1667_v39, %v2125_v10  ;;  %v1670_v47 = vadd.f32 %v1669_v44, %v1668_v40  ;;  %v1742_v48 = vadd.f32 %v1741_v45, %v1740_v42  ;;  %v917_v49 = vmul.f32 %v1739_v41, %v2173_v34  ;;  %v2200_v45 = vpop.permute.xlu1 %880 }
  0xfb   :  { %v932_v50 = vadd.f32 %v2178_v43, %v893_v46  ;;  %v894_v51 = vmul.f32 %v1670_v47, %v2129_v12  ;;  %v918_v52 = vmul.f32 %v1742_v48, %v2171_v33  ;;  %v956_v53 = vadd.f32 %v2178_v43, %v917_v49  ;;  %v2202_v46 = vpop.permute.xlu0 %875 }
  0xfd   :  { %v933_v56 = vadd.f32 %v2178_v43, %v894_v51  ;;  %v1671_v57 = vpop.f32.mrb[4].mxu0  ;;  %v1743_v58 = vpop.f32.mrb[4].mxu1  ;;  %v957_v59 = vadd.f32 %v2178_v43, %v918_v52  ;;  %v964_v60 = vmax.f32 %v932_v50, 0.0  ;;  %v988_v62 = vmax.f32 %v956_v53, 0.0 }
  0xfe   :  { %v1672_v61 = vpop.f32.mrb[5].mxu0  ;;  %v1744_v63 = vpop.f32.mrb[5].mxu1 }
  0xff   :  { %v965_v0 = vmax.f32 %v933_v56, 0.0  ;;  %v1673_v1 = vadd.f32 %v1672_v61, %v1671_v57  ;;  %v1674_v2 = vpop.f32.mrb[6].mxu0  ;;  %v989_v3 = vmax.f32 %v957_v59, 0.0  ;;  %v1745_v4 = vadd.f32 %v1744_v63, %v1743_v58  ;;  %v1746_v5 = vpop.f32.mrb[6].mxu1 }
 0x100   :  { %v1675_v6 = vpop.f32.mrb[7].mxu0  ;;  %v1747_v7 = vpop.f32.mrb[7].mxu1 }
 0x101   :  { %v895_v8 = vmul.f32 %v1673_v1, %v2123_v9  ;;  %v1676_v35 = vadd.f32 %v1675_v6, %v1674_v2  ;;  %v996_v36 = vpack.c.bf16 %v965_v0, %v964_v60  ;;  %v1748_v37 = vadd.f32 %v1747_v7, %v1746_v5 }
 0x102   :  { %v919_v38 = vmul.f32 %v1745_v4, %v2188_v55  ;;  %v2194_v39 = vpack.c.bf16 %v989_v3, %v988_v62 }
 0x103   :  { %v934_v40 = vadd.f32 %v2178_v43, %v895_v8  ;;  %v896_v41 = vmul.f32 %v1676_v35, %v2127_v11  ;;  %1801 = vmatprep.mubr.bf16.mxu1 %v996_v36  ;;  %v920_v42 = vmul.f32 %v1748_v37, %v2186_v54  ;;  %v2214_v37 = vpop.permute.xlu1 %890 }
 0x104   :  { %v958_v44 = vadd.f32 %v2178_v43, %v919_v38  ;;  %v2216_v38 = vpop.permute.xlu0 %885 }
 0x105   :  { %v935_v47 = vadd.f32 %v2178_v43, %v896_v41  ;;  %v1677_v48 = vpop.f32.mrb[8].mxu0  ;;  %v1749_v49 = vpop.f32.mrb[8].mxu1  ;;  %v959_v50 = vadd.f32 %v2178_v43, %v920_v42  ;;  %v966_v51 = vmax.f32 %v934_v40, 0.0 }
 0x106   :  { %v1678_v52 = vpop.f32.mrb[9].mxu0  ;;  %v990_v53 = vmax.f32 %v958_v44, 0.0  ;;  %v1750_v56 = vpop.f32.mrb[9].mxu1 }
 0x107   :  { %v967_v57 = vmax.f32 %v935_v47, 0.0  ;;  %v1679_v58 = vadd.f32 %v1678_v52, %v1677_v48  ;;  %v1680_v59 = vpop.f32.mrb[10].mxu0  ;;  %v991_v60 = vmax.f32 %v959_v50, 0.0  ;;  %v1751_v61 = vadd.f32 %v1750_v56, %v1749_v49  ;;  %v1752_v62 = vpop.f32.mrb[10].mxu1 }
 0x108   :  { %v1681_v63 = vpop.f32.mrb[11].mxu0  ;;  %v1753_v0 = vpop.f32.mrb[11].mxu1 }
 0x109   :  { %v997_v1 = vpack.c.bf16 %v967_v57, %v966_v51  ;;  %v897_v2 = vmul.f32 %v1679_v58, %v2133_v14  ;;  %v1682_v3 = vadd.f32 %v1681_v63, %v1680_v59  ;;  %v1754_v4 = vadd.f32 %v1753_v0, %v1752_v62 }
 0x10a   :  { %v921_v5 = vmul.f32 %v1751_v61, %v2202_v46  ;;  %v2208_v6 = vpack.c.bf16 %v991_v60, %v990_v53 }
 0x10b   :  { %v936_v7 = vadd.f32 %v2178_v43, %v897_v2  ;;  %v898_v8 = vmul.f32 %v1682_v3, %v2131_v13  ;;  %1802 = vmatmul.mubr.bf16.vlgmr.msra.gmra.mrb[16].mxu1 %v997_v1  ;;  %v922_v35 = vmul.f32 %v1754_v4, %v2200_v45 }
 0x10c   :  { %v960_v36 = vadd.f32 %v2178_v43, %v921_v5 }
 0x10d   :  { %v937_v40 = vadd.f32 %v2178_v43, %v898_v8  ;;  %v1683_v41 = vpop.f32.mrb[12].mxu0  ;;  %v1755_v42 = vpop.f32.mrb[12].mxu1  ;;  %v961_v44 = vadd.f32 %v2178_v43, %v922_v35  ;;  %v968_v47 = vmax.f32 %v936_v7, 0.0 }
 0x10e   :  { %v1684_v48 = vpop.f32.mrb[13].mxu0  ;;  %v992_v49 = vmax.f32 %v960_v36, 0.0  ;;  %v1756_v50 = vpop.f32.mrb[13].mxu1 }
 0x10f   :  { %v969_v51 = vmax.f32 %v937_v40, 0.0  ;;  %v1685_v52 = vadd.f32 %v1684_v48, %v1683_v41  ;;  %v1686_v53 = vpop.f32.mrb[14].mxu0  ;;  %v993_v56 = vmax.f32 %v961_v44, 0.0  ;;  %v1757_v57 = vadd.f32 %v1756_v50, %v1755_v42  ;;  %v1758_v58 = vpop.f32.mrb[14].mxu1 }
 0x110   :  { %v1687_v59 = vpop.f32.mrb[15].mxu0  ;;  %v1759_v60 = vpop.f32.mrb[15].mxu1 }
 0x111   :  { %v899_v61 = vmul.f32 %v1685_v52, %v2137_v16  ;;  %v1688_v62 = vadd.f32 %v1687_v59, %v1686_v53  ;;  %v998_v63 = vpack.c.bf16 %v969_v51, %v968_v47  ;;  %v1760_v0 = vadd.f32 %v1759_v60, %v1758_v58 }
 0x112   :  { %v923_v1 = vmul.f32 %v1757_v57, %v2216_v38  ;;  %v2222_v2 = vpack.c.bf16 %v993_v56, %v992_v49 }
 0x113   :  { %v938_v3 = vadd.f32 %v2178_v43, %v899_v61  ;;  %v900_v4 = vmul.f32 %v1688_v62, %v2135_v15  ;;  %1805 = vmatprep.mubr.bf16.mxu1 %v998_v63  ;;  %v924_v5 = vmul.f32 %v1760_v0, %v2214_v37 }
 0x114   :  { %v962_v7 = vadd.f32 %v2178_v43, %v923_v1 }
 0x115   :  { %v939_v8 = vadd.f32 %v2178_v43, %v900_v4  ;;  %v1689_v35 = vpop.f32.mrb[16].mxu0  ;;  %v963_v36 = vadd.f32 %v2178_v43, %v924_v5  ;;  %v970_v42 = vmax.f32 %v938_v3, 0.0 }
 0x116   :  { %v1690_v40 = vpop.f32.mrb[17].mxu0  ;;  %v994_v41 = vmax.f32 %v962_v7, 0.0 }
 0x117   :  { %v971_v44 = vmax.f32 %v939_v8, 0.0  ;;  %v1691_v47 = vadd.f32 %v1690_v40, %v1689_v35  ;;  %v1692_v48 = vpop.f32.mrb[18].mxu0  ;;  %v995_v49 = vmax.f32 %v963_v36, 0.0 }
 0x118   :  { %v1693_v50 = vpop.f32.mrb[19].mxu0 }
 0x119   :  { %v901_v51 = vmul.f32 %v1691_v47, %v2141_v18  ;;  %v1694_v52 = vadd.f32 %v1693_v50, %v1692_v48  ;;  %v999_v53 = vpack.c.bf16 %v971_v44, %v970_v42  ;;  %v2231_v56 = vpack.c.bf16 %v995_v49, %v994_v41 }
 0x11b   :  { %v940_v57 = vadd.f32 %v2178_v43, %v901_v51  ;;  %v902_v58 = vmul.f32 %v1694_v52, %v2139_v17  ;;  %1806 = vmatmul.mubr.bf16.gmra.mrb[20].mxu1 %v999_v53 }
 0x11d   :  { %v941_v59 = vadd.f32 %v2178_v43, %v902_v58  ;;  %v1695_v60 = vpop.f32.mrb[20].mxu0  ;;  %v972_v62 = vmax.f32 %v940_v57, 0.0 }
 0x11e   :  { %v1696_v61 = vpop.f32.mrb[21].mxu0 }
 0x11f   :  { %v973_v63 = vmax.f32 %v941_v59, 0.0  ;;  %v1697_v0 = vadd.f32 %v1696_v61, %v1695_v60  ;;  %v1698_v1 = vpop.f32.mrb[22].mxu0 }
 0x120   :  { %v1699_v3 = vpop.f32.mrb[23].mxu0 }
 0x121   :  { %v903_v4 = vmul.f32 %v1697_v0, %v2145_v20  ;;  %v1700_v5 = vadd.f32 %v1699_v3, %v1698_v1  ;;  %v1000_v7 = vpack.c.bf16 %v973_v63, %v972_v62 }
 0x123   :  { %v942_v8 = vadd.f32 %v2178_v43, %v903_v4  ;;  %v904_v35 = vmul.f32 %v1700_v5, %v2143_v19  ;;  %1809 = vmatprep.mubr.bf16.mxu1 %v1000_v7 }
 0x125   :  { %v943_v36 = vadd.f32 %v2178_v43, %v904_v35  ;;  %v1701_v40 = vpop.f32.mrb[24].mxu0  ;;  %v974_v42 = vmax.f32 %v942_v8, 0.0 }
 0x126   :  { %v1702_v41 = vpop.f32.mrb[25].mxu0 }
 0x127   :  { %v975_v44 = vmax.f32 %v943_v36, 0.0  ;;  %v1703_v47 = vadd.f32 %v1702_v41, %v1701_v40  ;;  %v1704_v48 = vpop.f32.mrb[26].mxu0 }
 0x128   :  { %v1705_v49 = vpop.f32.mrb[27].mxu0 }
 0x129   :  { %v905_v50 = vmul.f32 %v1703_v47, %v2149_v22  ;;  %v1706_v51 = vadd.f32 %v1705_v49, %v1704_v48  ;;  %v1001_v52 = vpack.c.bf16 %v975_v44, %v974_v42 }
 0x12b   :  { %v944_v53 = vadd.f32 %v2178_v43, %v905_v50  ;;  %v906_v57 = vmul.f32 %v1706_v51, %v2147_v21  ;;  %1810 = vmatmul.mubr.bf16.gmra.mrb[24].mxu1 %v1001_v52 }
 0x12d   :  { %v945_v58 = vadd.f32 %v2178_v43, %v906_v57  ;;  %v1707_v59 = vpop.f32.mrb[28].mxu0  ;;  %v976_v61 = vmax.f32 %v944_v53, 0.0 }
 0x12e   :  { %v1708_v60 = vpop.f32.mrb[29].mxu0 }
 0x12f   :  { %v977_v62 = vmax.f32 %v945_v58, 0.0  ;;  %v1709_v63 = vadd.f32 %v1708_v60, %v1707_v59  ;;  %v1710_v0 = vpop.f32.mrb[30].mxu0 }
 0x130   :  { %v1711_v1 = vpop.f32.mrb[31].mxu0 }
 0x131   :  { %v907_v3 = vmul.f32 %v1709_v63, %v2153_v24  ;;  %v1712_v4 = vadd.f32 %v1711_v1, %v1710_v0  ;;  %v1002_v5 = vpack.c.bf16 %v977_v62, %v976_v61 }
 0x133   :  { %v946_v7 = vadd.f32 %v2178_v43, %v907_v3  ;;  %v908_v8 = vmul.f32 %v1712_v4, %v2151_v23  ;;  %1813 = vmatprep.mubr.bf16.mxu1 %v1002_v5 }
 0x135   :  { %v947_v35 = vadd.f32 %v2178_v43, %v908_v8  ;;  %v1713_v36 = vpop.f32.mrb[32].mxu0  ;;  %v978_v41 = vmax.f32 %v946_v7, 0.0 }
 0x136   :  { %v1714_v40 = vpop.f32.mrb[33].mxu0 }
 0x137   :  { %v979_v42 = vmax.f32 %v947_v35, 0.0  ;;  %v1715_v44 = vadd.f32 %v1714_v40, %v1713_v36  ;;  %v1716_v47 = vpop.f32.mrb[34].mxu0 }
 0x138   :  { %v1717_v48 = vpop.f32.mrb[35].mxu0 }
 0x139   :  { %v909_v49 = vmul.f32 %v1715_v44, %v2157_v26  ;;  %v1718_v50 = vadd.f32 %v1717_v48, %v1716_v47  ;;  %v1003_v51 = vpack.c.bf16 %v979_v42, %v978_v41 }
 0x13b   :  { %v948_v52 = vadd.f32 %v2178_v43, %v909_v49  ;;  %v910_v53 = vmul.f32 %v1718_v50, %v2155_v25  ;;  %1814 = vmatmul.mubr.bf16.gmra.mrb[28].mxu1 %v1003_v51 }
 0x13d   :  { %v949_v57 = vadd.f32 %v2178_v43, %v910_v53  ;;  %v1719_v58 = vpop.f32.mrb[36].mxu0  ;;  %v980_v60 = vmax.f32 %v948_v52, 0.0 }
 0x13e   :  { %v1720_v59 = vpop.f32.mrb[37].mxu0 }
 0x13f   :  { %v981_v61 = vmax.f32 %v949_v57, 0.0  ;;  %v1721_v62 = vadd.f32 %v1720_v59, %v1719_v58  ;;  %v1722_v63 = vpop.f32.mrb[38].mxu0 }
 0x140   :  { %v1723_v0 = vpop.f32.mrb[39].mxu0 }
 0x141   :  { %v911_v1 = vmul.f32 %v1721_v62, %v2161_v28  ;;  %v1724_v3 = vadd.f32 %v1723_v0, %v1722_v63  ;;  %v1004_v4 = vpack.c.bf16 %v981_v61, %v980_v60 }
 0x143   :  { %v950_v5 = vadd.f32 %v2178_v43, %v911_v1  ;;  %v912_v7 = vmul.f32 %v1724_v3, %v2159_v27  ;;  %1817 = vmatprep.mubr.bf16.mxu1 %v1004_v4 }
 0x145   :  { %v951_v8 = vadd.f32 %v2178_v43, %v912_v7  ;;  %v1725_v35 = vpop.f32.mrb[40].mxu0  ;;  %v982_v40 = vmax.f32 %v950_v5, 0.0 }
 0x146   :  { %v1726_v36 = vpop.f32.mrb[41].mxu0 }
 0x147   :  { %v983_v41 = vmax.f32 %v951_v8, 0.0  ;;  %v1727_v42 = vadd.f32 %v1726_v36, %v1725_v35  ;;  %v1728_v44 = vpop.f32.mrb[42].mxu0 }
 0x148   :  { %v1729_v47 = vpop.f32.mrb[43].mxu0 }
 0x149   :  { %v913_v48 = vmul.f32 %v1727_v42, %v2165_v30  ;;  %v1730_v49 = vadd.f32 %v1729_v47, %v1728_v44  ;;  %v1005_v50 = vpack.c.bf16 %v983_v41, %v982_v40 }
 0x14b   :  { %v952_v51 = vadd.f32 %v2178_v43, %v913_v48  ;;  %v914_v52 = vmul.f32 %v1730_v49, %v2163_v29  ;;  %1818 = vmatmul.mubr.bf16.gmra.mrb[32].mxu1 %v1005_v50 }
 0x14d   :  { %v953_v53 = vadd.f32 %v2178_v43, %v914_v52  ;;  %v1731_v57 = vpop.f32.mrb[44].mxu0  ;;  %v984_v59 = vmax.f32 %v952_v51, 0.0 }
 0x14e   :  { %v1732_v58 = vpop.f32.mrb[45].mxu0 }
 0x14f   :  { %v985_v60 = vmax.f32 %v953_v53, 0.0  ;;  %v1733_v61 = vadd.f32 %v1732_v58, %v1731_v57  ;;  %v1734_v62 = vpop.f32.mrb[46].mxu0 }
 0x150   :  { %v1735_v63 = vpop.f32.mrb[47].mxu0 }
 0x151   :  { %v915_v0 = vmul.f32 %v1733_v61, %v2169_v32  ;;  %v1736_v1 = vadd.f32 %v1735_v63, %v1734_v62  ;;  %v1006_v3 = vpack.c.bf16 %v985_v60, %v984_v59 }
 0x153   :  { %v954_v4 = vadd.f32 %v2178_v43, %v915_v0  ;;  %v916_v5 = vmul.f32 %v1736_v1, %v2167_v31  ;;  %1821 = vmatprep.mubr.bf16.mxu1 %v1006_v3 }
 0x155   :  { %v955_v7 = vadd.f32 %v2178_v43, %v916_v5  ;;  %v986_v8 = vmax.f32 %v954_v4, 0.0 }
 0x157   :  { %v987_v35 = vmax.f32 %v955_v7, 0.0 }
 0x159   :  { %v1007_v36 = vpack.c.bf16 %v987_v35, %v986_v8 }
 0x15b   :  { %1822 = vmatmul.mubr.bf16.gmra.mrb[36].mxu1 %v1007_v36 }
 0x15c   :  { %1825 = vmatprep.mubr.bf16.mxu1 %v2194_v39 }
 0x163   :  { %1826 = vmatmul.mubr.bf16.gmra.mrb[40].mxu1 %v2208_v6 }
 0x164   :  { %1829 = vmatprep.mubr.bf16.mxu1 %v2222_v2 }
 0x16b   :  { %1830 = vmatmul.mubr.bf16.gmra.mrb[44].mxu1 %v2231_v56 }
 0x1de   :  { %v1803_v40 = vpop.f32.mrb[16].mxu1 }
 0x1df   :  { %v1110_v41 = vpop.f32.mrb[17].mxu1  ;;  %v1239_v44 = vmul.f32 %v1803_v40, %v2123_v9 }
 0x1e0   :  { %v1804_v42 = vpop.f32.mrb[18].mxu1  ;;  %v1237_v48 = vmul.f32 %v1110_v41, %v2125_v10 }
 0x1e1   :  { %v1240_v47 = vmul.f32 %v1804_v42, %v2127_v11  ;;  %v1113_v43 = vpop.f32.mrb[19].mxu1 }
 0x1e2   :  { %v1238_v49 = vmul.f32 %v1113_v43, %v2129_v12 }
 0x1e3   :  { %v1562_v50 = vpack.c.bf16 %v1240_v47, %v1239_v44 }
 0x1e4   :  { %v1557_v39 = vpack.c.bf16 %v1238_v49, %v1237_v48 }
 0x1e5   :  { %1634 = vst [vmem:[%s2353_s5 + $0x8] sm:$0xff] %v1562_v50  }
 0x1e6   :  { %1558 = vst [vmem:[%s2353_s5] sm:$0xff] %v1557_v39  }
 0x1ee   :  { %v1807_v6 = vpop.f32.mrb[20].mxu1 }
 0x1ef   :  { %v1126_v2 = vpop.f32.mrb[21].mxu1  ;;  %v1243_v11 = vmul.f32 %v1807_v6, %v2137_v16 }
 0x1f0   :  { %v1808_v9 = vpop.f32.mrb[22].mxu1  ;;  %v1241_v12 = vmul.f32 %v1126_v2, %v2133_v14 }
 0x1f1   :  { %v1244_v56 = vmul.f32 %v1808_v9, %v2135_v15  ;;  %v1129_v10 = vpop.f32.mrb[23].mxu1 }
 0x1f2   :  { %v1242_v51 = vmul.f32 %v1129_v10, %v2131_v13 }
 0x1f3   :  { %v1572_v52 = vpack.c.bf16 %v1244_v56, %v1243_v11 }
 0x1f4   :  { %v1567_v53 = vpack.c.bf16 %v1242_v51, %v1241_v12 }
 0x1f5   :  { %1636 = vst [vmem:[%s2353_s5 + $0x18] sm:$0xff] %v1572_v52  }
 0x1f6   :  { %1635 = vst [vmem:[%s2353_s5 + $0x10] sm:$0xff] %v1567_v53  }
 0x1fe   :  { %v1811_v57 = vpop.f32.mrb[24].mxu1 }
 0x1ff   :  { %v1142_v58 = vpop.f32.mrb[25].mxu1  ;;  %v1247_v15 = vmul.f32 %v1811_v57, %v2145_v20 }
 0x200   :  { %v1812_v16 = vpop.f32.mrb[26].mxu1  ;;  %v1245_v13 = vmul.f32 %v1142_v58, %v2141_v18 }
 0x201   :  { %v1248_v59 = vmul.f32 %v1812_v16, %v2143_v19  ;;  %v1145_v14 = vpop.f32.mrb[27].mxu1 }
 0x202   :  { %v1246_v60 = vmul.f32 %v1145_v14, %v2139_v17 }
 0x203   :  { %v1582_v61 = vpack.c.bf16 %v1248_v59, %v1247_v15 }
 0x204   :  { %v1577_v62 = vpack.c.bf16 %v1246_v60, %v1245_v13 }
 0x205   :  { %1638 = vst [vmem:[%s2353_s5 + $0x28] sm:$0xff] %v1582_v61  }
 0x206   :  { %1637 = vst [vmem:[%s2353_s5 + $0x20] sm:$0xff] %v1577_v62  }
 0x20e   :  { %v1815_v63 = vpop.f32.mrb[28].mxu1 }
 0x20f   :  { %v1158_v0 = vpop.f32.mrb[29].mxu1  ;;  %v1251_v19 = vmul.f32 %v1815_v63, %v2153_v24 }
 0x210   :  { %v1816_v20 = vpop.f32.mrb[30].mxu1  ;;  %v1249_v17 = vmul.f32 %v1158_v0, %v2149_v22 }
 0x211   :  { %v1252_v1 = vmul.f32 %v1816_v20, %v2151_v23  ;;  %v1161_v18 = vpop.f32.mrb[31].mxu1 }
 0x212   :  { %v1250_v3 = vmul.f32 %v1161_v18, %v2147_v21 }
 0x213   :  { %v1592_v4 = vpack.c.bf16 %v1252_v1, %v1251_v19 }
 0x214   :  { %v1587_v5 = vpack.c.bf16 %v1250_v3, %v1249_v17 }
 0x215   :  { %1640 = vst [vmem:[%s2353_s5 + $0x38] sm:$0xff] %v1592_v4  }
 0x216   :  { %1639 = vst [vmem:[%s2353_s5 + $0x30] sm:$0xff] %v1587_v5  }
 0x21e   :  { %v1819_v7 = vpop.f32.mrb[32].mxu1 }
 0x21f   :  { %v1174_v8 = vpop.f32.mrb[33].mxu1  ;;  %v1255_v23 = vmul.f32 %v1819_v7, %v2161_v28 }
 0x220   :  { %v1820_v24 = vpop.f32.mrb[34].mxu1  ;;  %v1253_v21 = vmul.f32 %v1174_v8, %v2157_v26 }
 0x221   :  { %v1256_v35 = vmul.f32 %v1820_v24, %v2159_v27  ;;  %v1177_v22 = vpop.f32.mrb[35].mxu1 }
 0x222   :  { %v1254_v36 = vmul.f32 %v1177_v22, %v2155_v25 }
 0x223   :  { %v1602_v40 = vpack.c.bf16 %v1256_v35, %v1255_v23 }
 0x224   :  { %v1597_v41 = vpack.c.bf16 %v1254_v36, %v1253_v21 }
 0x225   :  { %1642 = vst [vmem:[%s2353_s5 + $0x48] sm:$0xff] %v1602_v40  }
 0x226   :  { %1641 = vst [vmem:[%s2353_s5 + $0x40] sm:$0xff] %v1597_v41  }
 0x22e   :  { %v1823_v42 = vpop.f32.mrb[36].mxu1 }
 0x22f   :  { %v1190_v44 = vpop.f32.mrb[37].mxu1  ;;  %v1259_v27 = vmul.f32 %v1823_v42, %v2169_v32 }
 0x230   :  { %v1824_v28 = vpop.f32.mrb[38].mxu1  ;;  %v1257_v25 = vmul.f32 %v1190_v44, %v2165_v30 }
 0x231   :  { %v1260_v47 = vmul.f32 %v1824_v28, %v2167_v31  ;;  %v1193_v26 = vpop.f32.mrb[39].mxu1 }
 0x232   :  { %v1258_v43 = vmul.f32 %v1193_v26, %v2163_v29 }
 0x233   :  { %v1612_v48 = vpack.c.bf16 %v1260_v47, %v1259_v27 }
 0x234   :  { %v1607_v49 = vpack.c.bf16 %v1258_v43, %v1257_v25 }
 0x235   :  { %1644 = vst [vmem:[%s2353_s5 + $0x58] sm:$0xff] %v1612_v48  }
 0x236   :  { %1643 = vst [vmem:[%s2353_s5 + $0x50] sm:$0xff] %v1607_v49   ;;  %v1827_v50 = vpop.f32.mrb[40].mxu1 }
 0x237   :  { %v1206_v39 = vpop.f32.mrb[41].mxu1  ;;  %v1263_v31 = vmul.f32 %v1827_v50, %v2188_v55 }
 0x238   :  { %v1828_v32 = vpop.f32.mrb[42].mxu1  ;;  %v1261_v29 = vmul.f32 %v1206_v39, %v2173_v34 }
 0x239   :  { %v1264_v6 = vmul.f32 %v1828_v32, %v2186_v54  ;;  %v1209_v30 = vpop.f32.mrb[43].mxu1 }
 0x23a   :  { %v1262_v2 = vmul.f32 %v1209_v30, %v2171_v33 }
 0x23b   :  { %v1622_v9 = vpack.c.bf16 %v1264_v6, %v1263_v31 }
 0x23c   :  { %v1617_v11 = vpack.c.bf16 %v1262_v2, %v1261_v29 }
 0x23d   :  { %1646 = vst [vmem:[%s2353_s5 + $0x68] sm:$0xff] %v1622_v9  }
 0x23e   :  { %1645 = vst [vmem:[%s2353_s5 + $0x60] sm:$0xff] %v1617_v11   ;;  %v1831_v56 = vpop.f32.mrb[44].mxu1 }
 0x23f   :  { %v1222_v10 = vpop.f32.mrb[45].mxu1  ;;  %v1267_v54 = vmul.f32 %v1831_v56, %v2216_v38 }
 0x240   :  { %v1832_v55 = vpop.f32.mrb[46].mxu1  ;;  %v1265_v33 = vmul.f32 %v1222_v10, %v2202_v46 }
 0x241   :  { %v1268_v12 = vmul.f32 %v1832_v55, %v2214_v37  ;;  %v1225_v34 = vpop.f32.mrb[47].mxu1 }
 0x242   :  { %v1266_v51 = vmul.f32 %v1225_v34, %v2200_v45 }
 0x243   :  { %v1632_v52 = vpack.c.bf16 %v1268_v12, %v1267_v54 }
 0x244   :  { %v1627_v53 = vpack.c.bf16 %v1266_v51, %v1265_v33 }
 0x245   :  { %1648 = vst [vmem:[%s2353_s5 + $0x78] sm:$0xff] %v1632_v52  }
 0x246   :  { %1647 = vst [vmem:[%s2353_s5 + $0x70] sm:$0xff] %v1627_v53  }

// kernel: gcn_forward.3
= control target key start
LH: loop header
LB: loop body
LE: loop exit
PB: predicated region body
PF: predicated region fallthrough
CT: control target
= control target key end

     0   :  { %v1194_v1 = vmov 0   ;;  %s1581_s1 = inlined_call_operand.vmem [shape: bf16[256,128], index: 1, kind: input, shape index: {}]   ;;  %s1582_s0 = inlined_call_operand.vmem [shape: s8[256,256], index: 0, kind: input, shape index: {}]   ;;  %s1583_s2 = inlined_call_operand.vmem [shape: f32[256,1], index: 2, kind: input, shape index: {}]   ;;  %s1584_s3 = inlined_call_operand.vmem [shape: f32[1,128], index: 3, kind: input, shape index: {}]   ;;  %s1585_s4 = inlined_call_operand.vmem [shape: f32[256,128], index: 4, kind: output, shape index: {}]  }
   0x1   :  { %v1178_v0 = vld [vmem:[%s1581_s1 + $0x40] sm:$0xff]   ;;  %1177 = vset.pattern.permute.xlu1 %v1194_v1  ;;  %1176 = vset.pattern.permute.xlu0 %v1194_v1  ;;  %v1180_v3 = vld [vmem:[%s1581_s1 + $0x48] sm:$0xff]   ;;  %v1182_v5 = vld [vmem:[%s1581_s1 + $0x50] sm:$0xff]  }
   0x2   :  { %v1179_v2 = vld [vmem:[%s1581_s1] sm:$0xff]   ;;  %1046 = vmatprep.subr.bf16.mxu0 %v1178_v0  ;;  %1158 = vmatprep.subr.bf16.mxu1 %v1178_v0  ;;  %v1181_v4 = vld [vmem:[%s1581_s1 + $0x8] sm:$0xff]   ;;  %v1183_v6 = vld [vmem:[%s1581_s1 + $0x10] sm:$0xff]  }
   0x3   :  { %1047 = vmatpush3.bf16.msra.mxu0 %v1179_v2  ;;  %1166 = vmatpush3.bf16.msra.mxu1 %v1179_v2  ;;  %v1184_v7 = vld [vmem:[%s1581_s1 + $0x58] sm:$0xff]   ;;  %v1186_v9 = vld [vmem:[%s1581_s1 + $0x60] sm:$0xff]   ;;  %v1188_v11 = vld [vmem:[%s1581_s1 + $0x68] sm:$0xff]  }
   0x4   :  { %1048 = vmatprep.subr.bf16.mxu0 %v1180_v3  ;;  %1159 = vmatprep.subr.bf16.mxu1 %v1180_v3  ;;  %v1185_v8 = vld [vmem:[%s1581_s1 + $0x18] sm:$0xff]   ;;  %v1187_v10 = vld [vmem:[%s1581_s1 + $0x20] sm:$0xff]   ;;  %v1189_v18 = vld [vmem:[%s1581_s1 + $0x28] sm:$0xff]  }
   0x5   :  { %v86_v12 = vld [vmem:[%s1582_s0] sm:$0xff]   ;;  %v668_v21 = vld [vmem:[%s1583_s2 + $0x10] sm:$0xff]  ;;  %v669_v25 = vld [vmem:[%s1583_s2 + $0x18] sm:$0xff] }
   0x6   :  { %v102_v13 = vld [vmem:[%s1582_s0 + $0x40] sm:$0xff]   ;;  %v118_v14 = vunpack.c.l.s8.bf16 %v86_v12  ;;  %v119_v15 = vunpack.c.h.s8.bf16 %v86_v12  ;;  %v1190_v23 = vld [vmem:[%s1581_s1 + $0x70] sm:$0xff]   ;;  %742 = vperm.xlu1 %1177, %v668_v21   ;;  %v667_v26 = vld [vmem:[%s1583_s2 + $0x8] sm:$0xff] }
   0x7   :  { %1049 = vmatpush3.bf16.msra.mxu0 %v1181_v4  ;;  %1167 = vmatpush3.bf16.msra.mxu1 %v1181_v4  ;;  %v134_v16 = vunpack.c.l.s8.bf16 %v102_v13  ;;  %v135_v17 = vunpack.c.h.s8.bf16 %v102_v13  ;;  %v666_v22 = vld [vmem:[%s1583_s2] sm:$0xff]  ;;  %v1191_v24 = vld [vmem:[%s1581_s1 + $0x30] sm:$0xff]   ;;  %v1192_v27 = vld [vmem:[%s1581_s1 + $0x78] sm:$0xff]  }
   0x8   :  { %1050 = vmatprep.subr.bf16.mxu0 %v1182_v5  ;;  %1160 = vmatprep.subr.bf16.mxu1 %v1182_v5  ;;  %v998_v19 = vcombine.high %v118_v14, %v119_v15  ;;  %v88_v28 = vld [vmem:[%s1582_s0 + $0x8] sm:$0xff]   ;;  %v1193_v30 = vld [vmem:[%s1581_s1 + $0x38] sm:$0xff]   ;;  %v670_v36 = vld [vmem:[%s1583_s2 + $0x20] sm:$0xff]  ;;  %v997_v37 = vcombine.low %v118_v14, %v119_v15 }
   0x9   :  { %v1014_v20 = vcombine.high %v134_v16, %v135_v17  ;;  %732 = vperm.xlu0 %1176, %v666_v22   ;;  %v104_v29 = vld [vmem:[%s1582_s0 + $0x48] sm:$0xff]   ;;  %v120_v31 = vunpack.c.l.s8.bf16 %v88_v28  ;;  %v121_v32 = vunpack.c.h.s8.bf16 %v88_v28  ;;  %v1013_v38 = vcombine.low %v134_v16, %v135_v17  ;;  %v90_v41 = vld [vmem:[%s1582_s0 + $0x10] sm:$0xff]   ;;  %v673_v43 = vld [vmem:[%s1583_s2 + $0x38] sm:$0xff] }
   0xa   :  { %470 = vmatprep.mubr.bf16.mxu0 %v998_v19  ;;  %747 = vperm.xlu1 %1177, %v669_v25   ;;  %v136_v33 = vunpack.c.l.s8.bf16 %v104_v29  ;;  %v137_v34 = vunpack.c.h.s8.bf16 %v104_v29  ;;  %v671_v35 = vld [vmem:[%s1583_s2 + $0x28] sm:$0xff]  ;;  %v106_v42 = vld [vmem:[%s1582_s0 + $0x50] sm:$0xff]   ;;  %v122_v45 = vunpack.c.l.s8.bf16 %v90_v41  ;;  %v123_v46 = vunpack.c.h.s8.bf16 %v90_v41  ;;  %v674_v50 = vld [vmem:[%s1583_s2 + $0x40] sm:$0xff] }
   0xb   :  { %1051 = vmatpush3.bf16.msra.mxu0 %v1183_v6  ;;  %1168 = vmatpush3.bf16.msra.mxu1 %v1183_v6  ;;  %v1000_v39 = vcombine.high %v120_v31, %v121_v32  ;;  %v672_v44 = vld [vmem:[%s1583_s2 + $0x30] sm:$0xff]  ;;  %v138_v47 = vunpack.c.l.s8.bf16 %v106_v42  ;;  %v139_v48 = vunpack.c.h.s8.bf16 %v106_v42  ;;  %v675_v49 = vld [vmem:[%s1583_s2 + $0x48] sm:$0xff]  ;;  %v999_v51 = vcombine.low %v120_v31, %v121_v32  ;;  %v92_v55 = vld [vmem:[%s1582_s0 + $0x18] sm:$0xff]  }
   0xc   :  { %1052 = vmatprep.subr.bf16.mxu0 %v1184_v7  ;;  %1161 = vmatprep.subr.bf16.mxu1 %v1184_v7  ;;  %v1016_v40 = vcombine.high %v136_v33, %v137_v34  ;;  %v1015_v52 = vcombine.low %v136_v33, %v137_v34  ;;  %v1002_v53 = vcombine.high %v122_v45, %v123_v46  ;;  %v108_v56 = vld [vmem:[%s1582_s0 + $0x58] sm:$0xff]   ;;  %v676_v58 = vld [vmem:[%s1583_s2 + $0x50] sm:$0xff]  ;;  %v124_v59 = vunpack.c.l.s8.bf16 %v92_v55  ;;  %v679_v63 = vld [vmem:[%s1583_s2 + $0x68] sm:$0xff] }
   0xd   :  { %534 = vmatprep.mubr.bf16.mxu1 %v1014_v20  ;;  %737 = vperm.xlu0 %1176, %v667_v26   ;;  %v1018_v54 = vcombine.high %v138_v47, %v139_v48  ;;  %v677_v57 = vld [vmem:[%s1583_s2 + $0x58] sm:$0xff]  ;;  %v125_v60 = vunpack.c.h.s8.bf16 %v92_v55  ;;  %v140_v61 = vunpack.c.l.s8.bf16 %v108_v56  ;;  %v141_v62 = vunpack.c.h.s8.bf16 %v108_v56  ;;  %v678_v0 = vld [vmem:[%s1583_s2 + $0x60] sm:$0xff]  ;;  %v683_v13 = vld [vmem:[%s1583_s2 + $0x88] sm:$0xff] }
   0xe   :  { %757 = vperm.xlu1 %1177, %v671_v35   ;;  %v1001_v1 = vcombine.low %v122_v45, %v123_v46  ;;  %v1017_v2 = vcombine.low %v138_v47, %v139_v48  ;;  %v94_v5 = vld [vmem:[%s1582_s0 + $0x20] sm:$0xff]   ;;  %v681_v7 = vld [vmem:[%s1583_s2 + $0x78] sm:$0xff]  ;;  %v96_v19 = vld [vmem:[%s1582_s0 + $0x28] sm:$0xff]  }
   0xf   :  { %1053 = vmatpush3.bf16.msra.mxu0 %v1185_v8  ;;  %1169 = vmatpush3.bf16.msra.mxu1 %v1185_v8  ;;  %v1004_v3 = vcombine.high %v124_v59, %v125_v60  ;;  %v1020_v4 = vcombine.high %v140_v61, %v141_v62  ;;  %v110_v6 = vld [vmem:[%s1582_s0 + $0x60] sm:$0xff]   ;;  %v680_v8 = vld [vmem:[%s1583_s2 + $0x70] sm:$0xff]  ;;  %v1003_v15 = vcombine.low %v124_v59, %v125_v60  ;;  %v112_v20 = vld [vmem:[%s1582_s0 + $0x68] sm:$0xff]  }
  0x10   :  { %1054 = vmatprep.subr.bf16.mxu0 %v1186_v9  ;;  %1162 = vmatprep.subr.bf16.mxu1 %v1186_v9  ;;  %v126_v9 = vunpack.c.l.s8.bf16 %v94_v5  ;;  %v143_v12 = vunpack.c.h.s8.bf16 %v110_v6  ;;  %v682_v14 = vld [vmem:[%s1583_s2 + $0x80] sm:$0xff]  ;;  %v1019_v16 = vcombine.low %v140_v61, %v141_v62  ;;  %v685_v21 = vld [vmem:[%s1583_s2 + $0x98] sm:$0xff]  ;;  %v684_v22 = vld [vmem:[%s1583_s2 + $0x90] sm:$0xff]  ;;  %v144_v25 = vunpack.c.l.s8.bf16 %v112_v20 }
  0x11   :  { %752 = vperm.xlu0 %1176, %v670_v36   ;;  %v145_v26 = vunpack.c.h.s8.bf16 %v112_v20  ;;  %v686_v28 = vld [vmem:[%s1583_s2 + $0xa0] sm:$0xff]  ;;  %v98_v33 = vld [vmem:[%s1582_s0 + $0x30] sm:$0xff]   ;;  %v689_v35 = vld [vmem:[%s1583_s2 + $0xb8] sm:$0xff] }
  0x12   :  { %767 = vperm.xlu1 %1177, %v673_v43   ;;  %v114_v34 = vld [vmem:[%s1582_s0 + $0x70] sm:$0xff]   ;;  %v691_v41 = vld [vmem:[%s1583_s2 + $0xc8] sm:$0xff]  ;;  %v690_v42 = vld [vmem:[%s1583_s2 + $0xc0] sm:$0xff] }
  0x13   :  { %1055 = vmatpush3.bf16.msra.mxu0 %v1187_v10  ;;  %1170 = vmatpush3.bf16.msra.mxu1 %v1187_v10  ;;  %v127_v10 = vunpack.c.h.s8.bf16 %v94_v5  ;;  %v1024_v32 = vcombine.high %v144_v25, %v145_v26  ;;  %v688_v36 = vld [vmem:[%s1583_s2 + $0xb0] sm:$0xff]  ;;  %v100_v47 = vld [vmem:[%s1582_s0 + $0x38] sm:$0xff]   ;;  %v695_v55 = vld [vmem:[%s1583_s2 + $0xe8] sm:$0xff] }
  0x14   :  { %1056 = vmatprep.subr.bf16.mxu0 %v1188_v11  ;;  %1163 = vmatprep.subr.bf16.mxu1 %v1188_v11  ;;  %v142_v11 = vunpack.c.l.s8.bf16 %v110_v6  ;;  %v116_v48 = vld [vmem:[%s1582_s0 + $0x78] sm:$0xff]   ;;  %v694_v56 = vld [vmem:[%s1583_s2 + $0xe0] sm:$0xff]  ;;  %v696_v62 = vld [vmem:[%s1583_s2 + $0xf0] sm:$0xff] }
  0x15   :  { %762 = vperm.xlu0 %1176, %v672_v44   ;;  %v1006_v17 = vcombine.high %v126_v9, %v127_v10  ;;  %v1005_v29 = vcombine.low %v126_v9, %v127_v10  ;;  %v1023_v44 = vcombine.low %v144_v25, %v145_v26  ;;  %v697_v61 = vld [vmem:[%s1583_s2 + $0xf8] sm:$0xff] }
  0x16   :  { %777 = vperm.xlu1 %1177, %v675_v49   ;;  %v693_v49 = vld [vmem:[%s1583_s2 + $0xd8] sm:$0xff] }
  0x17   :  { %1057 = vmatpush3.bf16.msra.mxu0 %v1189_v18  ;;  %1171 = vmatpush3.bf16.msra.mxu1 %v1189_v18  ;;  %v1022_v18 = vcombine.high %v142_v11, %v143_v12 }
  0x18   :  { %1058 = vmatprep.subr.bf16.mxu0 %v1190_v23  ;;  %1164 = vmatprep.subr.bf16.mxu1 %v1190_v23  ;;  %v128_v23 = vunpack.c.l.s8.bf16 %v96_v19 }
  0x19   :  { %772 = vperm.xlu0 %1176, %v674_v50   ;;  %v692_v50 = vld [vmem:[%s1583_s2 + $0xd0] sm:$0xff] }
  0x1a   :  { %787 = vperm.xlu1 %1177, %v677_v57  }
  0x1b   :  { %1059 = vmatpush3.bf16.msra.mxu0 %v1191_v24  ;;  %1172 = vmatpush3.bf16.msra.mxu1 %v1191_v24  ;;  %v129_v24 = vunpack.c.h.s8.bf16 %v96_v19 }
  0x1c   :  { %1060 = vmatprep.subr.bf16.mxu0 %v1192_v27  ;;  %1165 = vmatprep.subr.bf16.mxu1 %v1192_v27  ;;  %v687_v27 = vld [vmem:[%s1583_s2 + $0xa8] sm:$0xff] }
  0x1d   :  { %782 = vperm.xlu0 %1176, %v676_v58   ;;  %v1008_v31 = vcombine.high %v128_v23, %v129_v24  ;;  %v1007_v43 = vcombine.low %v128_v23, %v129_v24 }
  0x1e   :  { %797 = vperm.xlu1 %1177, %v679_v63  }
  0x1f   :  { %1061 = vmatpush3.bf16.msra.mxu0 %v1193_v30  ;;  %1173 = vmatpush3.bf16.msra.mxu1 %v1193_v30  ;;  %v1021_v30 = vcombine.low %v142_v11, %v143_v12 }
  0x21   :  { %792 = vperm.xlu0 %1176, %v678_v0  }
  0x22   :  { %471 = vmatmul.mubr.bf16.vlgmr.msra.gmra.mrb[0].mxu0 %v997_v37  ;;  %535 = vmatmul.mubr.bf16.vlgmr.msra.gmra.mrb[0].mxu1 %v1013_v38  ;;  %v130_v37 = vunpack.c.l.s8.bf16 %v98_v33  ;;  %v131_v38 = vunpack.c.h.s8.bf16 %v98_v33 }
  0x23   :  { %478 = vmatprep.mubr.bf16.mxu0 %v1000_v39  ;;  %542 = vmatprep.mubr.bf16.mxu1 %v1016_v40  ;;  %v146_v39 = vunpack.c.l.s8.bf16 %v114_v34  ;;  %v147_v40 = vunpack.c.h.s8.bf16 %v114_v34 }
  0x24   :  { %807 = vperm.xlu1 %1177, %v681_v7   ;;  %v1010_v45 = vcombine.high %v130_v37, %v131_v38  ;;  %v1009_v57 = vcombine.low %v130_v37, %v131_v38 }
  0x25   :  { %802 = vperm.xlu0 %1176, %v680_v8   ;;  %v1026_v46 = vcombine.high %v146_v39, %v147_v40  ;;  %v1025_v58 = vcombine.low %v146_v39, %v147_v40 }
  0x28   :  { %817 = vperm.xlu1 %1177, %v683_v13  }
  0x29   :  { %812 = vperm.xlu0 %1176, %v682_v14  }
  0x2a   :  { %479 = vmatmul.mubr.bf16.gmra.mrb[4].mxu0 %v999_v51  ;;  %543 = vmatmul.mubr.bf16.gmra.mrb[4].mxu1 %v1015_v52  ;;  %v132_v51 = vunpack.c.l.s8.bf16 %v100_v47  ;;  %v133_v52 = vunpack.c.h.s8.bf16 %v100_v47 }
  0x2b   :  { %486 = vmatprep.mubr.bf16.mxu0 %v1002_v53  ;;  %550 = vmatprep.mubr.bf16.mxu1 %v1018_v54  ;;  %v148_v53 = vunpack.c.l.s8.bf16 %v116_v48  ;;  %v149_v54 = vunpack.c.h.s8.bf16 %v116_v48 }
  0x2c   :  { %827 = vperm.xlu1 %1177, %v685_v21   ;;  %v1012_v59 = vcombine.high %v132_v51, %v133_v52  ;;  %v1011_v63 = vcombine.low %v132_v51, %v133_v52 }
  0x2d   :  { %822 = vperm.xlu0 %1176, %v684_v22   ;;  %v1028_v60 = vcombine.high %v148_v53, %v149_v54  ;;  %v1027_v0 = vcombine.low %v148_v53, %v149_v54 }
  0x30   :  { %837 = vperm.xlu1 %1177, %v687_v27  }
  0x31   :  { %832 = vperm.xlu0 %1176, %v686_v28  }
  0x32   :  { %487 = vmatmul.mubr.bf16.gmra.mrb[8].mxu0 %v1001_v1  ;;  %551 = vmatmul.mubr.bf16.gmra.mrb[8].mxu1 %v1017_v2 }
  0x33   :  { %494 = vmatprep.mubr.bf16.mxu0 %v1004_v3  ;;  %558 = vmatprep.mubr.bf16.mxu1 %v1020_v4 }
  0x34   :  { %847 = vperm.xlu1 %1177, %v689_v35  }
  0x35   :  { %842 = vperm.xlu0 %1176, %v688_v36  }
  0x38   :  { %857 = vperm.xlu1 %1177, %v691_v41  }
  0x39   :  { %852 = vperm.xlu0 %1176, %v690_v42  }
  0x3a   :  { %495 = vmatmul.mubr.bf16.gmra.mrb[12].mxu0 %v1003_v15  ;;  %559 = vmatmul.mubr.bf16.gmra.mrb[12].mxu1 %v1019_v16 }
  0x3b   :  { %502 = vmatprep.mubr.bf16.mxu0 %v1006_v17  ;;  %566 = vmatprep.mubr.bf16.mxu1 %v1022_v18 }
  0x3c   :  { %867 = vperm.xlu1 %1177, %v693_v49  }
  0x3d   :  { %862 = vperm.xlu0 %1176, %v692_v50  }
  0x40   :  { %877 = vperm.xlu1 %1177, %v695_v55  }
  0x41   :  { %872 = vperm.xlu0 %1176, %v694_v56  }
  0x42   :  { %503 = vmatmul.mubr.bf16.gmra.mrb[16].mxu0 %v1005_v29  ;;  %567 = vmatmul.mubr.bf16.gmra.mrb[16].mxu1 %v1021_v30  ;;  %v1439_v30 = vld [vmem:[%s1584_s3] ss:$0 sm:$0xff] }
  0x43   :  { %510 = vmatprep.mubr.bf16.mxu0 %v1008_v31  ;;  %574 = vmatprep.mubr.bf16.mxu1 %v1024_v32 }
  0x44   :  { %887 = vperm.xlu1 %1177, %v697_v61  }
  0x45   :  { %882 = vperm.xlu0 %1176, %v696_v62  }
  0x4a   :  { %511 = vmatmul.mubr.bf16.gmra.mrb[20].mxu0 %v1007_v43  ;;  %575 = vmatmul.mubr.bf16.gmra.mrb[20].mxu1 %v1023_v44 }
  0x4b   :  { %518 = vmatprep.mubr.bf16.mxu0 %v1010_v45  ;;  %582 = vmatprep.mubr.bf16.mxu1 %v1026_v46 }
  0x52   :  { %519 = vmatmul.mubr.bf16.gmra.mrb[24].mxu0 %v1009_v57  ;;  %583 = vmatmul.mubr.bf16.gmra.mrb[24].mxu1 %v1025_v58 }
  0x53   :  { %526 = vmatprep.mubr.bf16.mxu0 %v1012_v59  ;;  %590 = vmatprep.mubr.bf16.mxu1 %v1028_v60 }
  0x5a   :  { %527 = vmatmul.mubr.bf16.gmra.mrb[28].mxu0 %v1011_v63  ;;  %591 = vmatmul.mubr.bf16.gmra.mrb[28].mxu1 %v1027_v0 }
  0x85   :  { %v743_v1 = vpop.permute.xlu1 %742 }
  0x88   :  { %v733_v2 = vpop.permute.xlu0 %732 }
  0x89   :  { %v748_v3 = vpop.permute.xlu1 %747 }
  0x8c   :  { %v738_v4 = vpop.permute.xlu0 %737 }
  0x8d   :  { %v1412_v5 = vpop.permute.xlu1 %757 }
  0x90   :  { %v1414_v6 = vpop.permute.xlu0 %752 }
  0x91   :  { %v1416_v7 = vpop.permute.xlu1 %767 }
  0x94   :  { %v1418_v8 = vpop.permute.xlu0 %762 }
  0x95   :  { %v1420_v9 = vpop.permute.xlu1 %777 }
  0x98   :  { %v1422_v10 = vpop.permute.xlu0 %772 }
  0x99   :  { %v1424_v11 = vpop.permute.xlu1 %787 }
  0x9c   :  { %v1426_v12 = vpop.permute.xlu0 %782 }
  0x9d   :  { %v1428_v13 = vpop.permute.xlu1 %797 }
  0xa0   :  { %v1430_v14 = vpop.permute.xlu0 %792 }
  0xa3   :  { %v1432_v15 = vpop.permute.xlu1 %807 }
  0xa4   :  { %v1434_v16 = vpop.permute.xlu0 %802 }
  0xa7   :  { %v818_v33 = vpop.permute.xlu1 %817 }
  0xa8   :  { %v813_v29 = vpop.permute.xlu0 %812 }
  0xab   :  { %v828_v55 = vpop.permute.xlu1 %827 }
  0xac   :  { %v823_v52 = vpop.permute.xlu0 %822 }
  0xf5   :  { %v1062_v17 = vpop.f32.mrb[0].mxu0  ;;  %v1110_v18 = vpop.f32.mrb[0].mxu1 }
  0xf6   :  { %v1063_v19 = vpop.f32.mrb[1].mxu0  ;;  %v1111_v20 = vpop.f32.mrb[1].mxu1 }
  0xf7   :  { %v1064_v21 = vadd.f32 %v1063_v19, %v1062_v17  ;;  %v1112_v22 = vadd.f32 %v1111_v20, %v1110_v18  ;;  %v1065_v23 = vpop.f32.mrb[2].mxu0  ;;  %v1113_v24 = vpop.f32.mrb[2].mxu1 }
  0xf8   :  { %v1066_v25 = vpop.f32.mrb[3].mxu0  ;;  %v1114_v26 = vpop.f32.mrb[3].mxu1 }
  0xf9   :  { %v1067_v27 = vadd.f32 %v1066_v25, %v1065_v23  ;;  %v1115_v28 = vadd.f32 %v1114_v26, %v1113_v24  ;;  %v890_v31 = vmul.f32 %v1064_v21, %v733_v2  ;;  %v906_v32 = vmul.f32 %v1112_v22, %v813_v29  ;;  %v833_v22 = vpop.permute.xlu0 %832  ;;  %v838_v25 = vpop.permute.xlu1 %837 }
  0xfb   :  { %v929_v34 = vadd.f32 %v1439_v30, %v890_v31  ;;  %v945_v35 = vadd.f32 %v1439_v30, %v906_v32  ;;  %v891_v36 = vmul.f32 %v1067_v27, %v738_v4  ;;  %v907_v37 = vmul.f32 %v1115_v28, %v818_v33 }
  0xfd   :  { %v1068_v38 = vpop.f32.mrb[4].mxu0  ;;  %v1116_v39 = vpop.f32.mrb[4].mxu1  ;;  %961 = vst [vmem:[%s1585_s4] sm:$0xff] %v929_v34  ;;  %977 = vst [vmem:[%s1585_s4 + $0x80] sm:$0xff] %v945_v35  ;;  %v930_v42 = vadd.f32 %v1439_v30, %v891_v36  ;;  %v946_v43 = vadd.f32 %v1439_v30, %v907_v37 }
  0xfe   :  { %v1069_v40 = vpop.f32.mrb[5].mxu0  ;;  %v1117_v41 = vpop.f32.mrb[5].mxu1 }
  0xff   :  { %v1070_v44 = vadd.f32 %v1069_v40, %v1068_v38  ;;  %v1118_v45 = vadd.f32 %v1117_v41, %v1116_v39  ;;  %v1071_v46 = vpop.f32.mrb[6].mxu0  ;;  %v1119_v47 = vpop.f32.mrb[6].mxu1  ;;  %962 = vst [vmem:[%s1585_s4 + $0x8] sm:$0xff] %v930_v42  ;;  %978 = vst [vmem:[%s1585_s4 + $0x88] sm:$0xff] %v946_v43 }
 0x100   :  { %v1072_v48 = vpop.f32.mrb[7].mxu0  ;;  %v1120_v49 = vpop.f32.mrb[7].mxu1 }
 0x101   :  { %v1073_v50 = vadd.f32 %v1072_v48, %v1071_v46  ;;  %v1121_v51 = vadd.f32 %v1120_v49, %v1119_v47  ;;  %v892_v53 = vmul.f32 %v1070_v44, %v743_v1  ;;  %v908_v54 = vmul.f32 %v1118_v45, %v823_v52  ;;  %v843_v43 = vpop.permute.xlu0 %842  ;;  %v848_v46 = vpop.permute.xlu1 %847 }
 0x103   :  { %v931_v56 = vadd.f32 %v1439_v30, %v892_v53  ;;  %v947_v57 = vadd.f32 %v1439_v30, %v908_v54  ;;  %v893_v58 = vmul.f32 %v1073_v50, %v748_v3  ;;  %v909_v59 = vmul.f32 %v1121_v51, %v828_v55 }
 0x105   :  { %v1074_v60 = vpop.f32.mrb[8].mxu0  ;;  %v1122_v61 = vpop.f32.mrb[8].mxu1  ;;  %963 = vst [vmem:[%s1585_s4 + $0x10] sm:$0xff] %v931_v56  ;;  %979 = vst [vmem:[%s1585_s4 + $0x90] sm:$0xff] %v947_v57  ;;  %v932_v0 = vadd.f32 %v1439_v30, %v893_v58  ;;  %v948_v1 = vadd.f32 %v1439_v30, %v909_v59 }
 0x106   :  { %v1075_v62 = vpop.f32.mrb[9].mxu0  ;;  %v1123_v63 = vpop.f32.mrb[9].mxu1 }
 0x107   :  { %v1076_v2 = vadd.f32 %v1075_v62, %v1074_v60  ;;  %v1124_v4 = vadd.f32 %v1123_v63, %v1122_v61  ;;  %v1077_v3 = vpop.f32.mrb[10].mxu0  ;;  %v1125_v17 = vpop.f32.mrb[10].mxu1  ;;  %964 = vst [vmem:[%s1585_s4 + $0x18] sm:$0xff] %v932_v0  ;;  %980 = vst [vmem:[%s1585_s4 + $0x98] sm:$0xff] %v948_v1 }
 0x108   :  { %v1078_v18 = vpop.f32.mrb[11].mxu0  ;;  %v1126_v19 = vpop.f32.mrb[11].mxu1 }
 0x109   :  { %v1079_v20 = vadd.f32 %v1078_v18, %v1077_v3  ;;  %v1127_v21 = vadd.f32 %v1126_v19, %v1125_v17  ;;  %v894_v23 = vmul.f32 %v1076_v2, %v1414_v6  ;;  %v910_v24 = vmul.f32 %v1124_v4, %v833_v22  ;;  %v853_v63 = vpop.permute.xlu0 %852  ;;  %v858_v2 = vpop.permute.xlu1 %857 }
 0x10b   :  { %v933_v26 = vadd.f32 %v1439_v30, %v894_v23  ;;  %v949_v27 = vadd.f32 %v1439_v30, %v910_v24  ;;  %v895_v28 = vmul.f32 %v1079_v20, %v1412_v5  ;;  %v911_v29 = vmul.f32 %v1127_v21, %v838_v25 }
 0x10d   :  { %v1080_v31 = vpop.f32.mrb[12].mxu0  ;;  %v1128_v32 = vpop.f32.mrb[12].mxu1  ;;  %965 = vst [vmem:[%s1585_s4 + $0x20] sm:$0xff] %v933_v26  ;;  %981 = vst [vmem:[%s1585_s4 + $0xa0] sm:$0xff] %v949_v27  ;;  %v934_v6 = vadd.f32 %v1439_v30, %v895_v28  ;;  %v950_v35 = vadd.f32 %v1439_v30, %v911_v29 }
 0x10e   :  { %v1081_v33 = vpop.f32.mrb[13].mxu0  ;;  %v1129_v34 = vpop.f32.mrb[13].mxu1 }
 0x10f   :  { %v1082_v36 = vadd.f32 %v1081_v33, %v1080_v31  ;;  %v1130_v37 = vadd.f32 %v1129_v34, %v1128_v32  ;;  %v1083_v5 = vpop.f32.mrb[14].mxu0  ;;  %v1131_v38 = vpop.f32.mrb[14].mxu1  ;;  %966 = vst [vmem:[%s1585_s4 + $0x28] sm:$0xff] %v934_v6  ;;  %982 = vst [vmem:[%s1585_s4 + $0xa8] sm:$0xff] %v950_v35 }
 0x110   :  { %v1084_v39 = vpop.f32.mrb[15].mxu0  ;;  %v1132_v40 = vpop.f32.mrb[15].mxu1 }
 0x111   :  { %v1085_v41 = vadd.f32 %v1084_v39, %v1083_v5  ;;  %v1133_v42 = vadd.f32 %v1132_v40, %v1131_v38  ;;  %v896_v44 = vmul.f32 %v1082_v36, %v1418_v8  ;;  %v912_v45 = vmul.f32 %v1130_v37, %v843_v43  ;;  %v863_v32 = vpop.permute.xlu0 %862  ;;  %v868_v6 = vpop.permute.xlu1 %867 }
 0x113   :  { %v935_v47 = vadd.f32 %v1439_v30, %v896_v44  ;;  %v951_v48 = vadd.f32 %v1439_v30, %v912_v45  ;;  %v897_v49 = vmul.f32 %v1085_v41, %v1416_v7  ;;  %v913_v50 = vmul.f32 %v1133_v42, %v848_v46 }
 0x115   :  { %v1086_v51 = vpop.f32.mrb[16].mxu0  ;;  %v1134_v52 = vpop.f32.mrb[16].mxu1  ;;  %967 = vst [vmem:[%s1585_s4 + $0x30] sm:$0xff] %v935_v47  ;;  %983 = vst [vmem:[%s1585_s4 + $0xb0] sm:$0xff] %v951_v48  ;;  %v936_v8 = vadd.f32 %v1439_v30, %v897_v49  ;;  %v952_v55 = vadd.f32 %v1439_v30, %v913_v50 }
 0x116   :  { %v1087_v53 = vpop.f32.mrb[17].mxu0  ;;  %v1135_v54 = vpop.f32.mrb[17].mxu1 }
 0x117   :  { %v1088_v56 = vadd.f32 %v1087_v53, %v1086_v51  ;;  %v1136_v57 = vadd.f32 %v1135_v54, %v1134_v52  ;;  %v1089_v7 = vpop.f32.mrb[18].mxu0  ;;  %v1137_v58 = vpop.f32.mrb[18].mxu1  ;;  %968 = vst [vmem:[%s1585_s4 + $0x38] sm:$0xff] %v936_v8  ;;  %984 = vst [vmem:[%s1585_s4 + $0xb8] sm:$0xff] %v952_v55 }
 0x118   :  { %v1090_v59 = vpop.f32.mrb[19].mxu0  ;;  %v1138_v60 = vpop.f32.mrb[19].mxu1 }
 0x119   :  { %v1091_v61 = vadd.f32 %v1090_v59, %v1089_v7  ;;  %v1139_v62 = vadd.f32 %v1138_v60, %v1137_v58  ;;  %v898_v0 = vmul.f32 %v1088_v56, %v1422_v10  ;;  %v914_v1 = vmul.f32 %v1136_v57, %v853_v63  ;;  %v873_v50 = vpop.permute.xlu0 %872  ;;  %v878_v53 = vpop.permute.xlu1 %877 }
 0x11b   :  { %v937_v4 = vadd.f32 %v1439_v30, %v898_v0  ;;  %v953_v3 = vadd.f32 %v1439_v30, %v914_v1  ;;  %v899_v17 = vmul.f32 %v1091_v61, %v1420_v9  ;;  %v915_v18 = vmul.f32 %v1139_v62, %v858_v2 }
 0x11d   :  { %v1092_v19 = vpop.f32.mrb[20].mxu0  ;;  %v1140_v20 = vpop.f32.mrb[20].mxu1  ;;  %969 = vst [vmem:[%s1585_s4 + $0x40] sm:$0xff] %v937_v4  ;;  %985 = vst [vmem:[%s1585_s4 + $0xc0] sm:$0xff] %v953_v3  ;;  %v938_v10 = vadd.f32 %v1439_v30, %v899_v17  ;;  %v954_v23 = vadd.f32 %v1439_v30, %v915_v18 }
 0x11e   :  { %v1093_v21 = vpop.f32.mrb[21].mxu0  ;;  %v1141_v22 = vpop.f32.mrb[21].mxu1 }
 0x11f   :  { %v1094_v24 = vadd.f32 %v1093_v21, %v1092_v19  ;;  %v1142_v25 = vadd.f32 %v1141_v22, %v1140_v20  ;;  %v1095_v9 = vpop.f32.mrb[22].mxu0  ;;  %v1143_v26 = vpop.f32.mrb[22].mxu1  ;;  %970 = vst [vmem:[%s1585_s4 + $0x48] sm:$0xff] %v938_v10  ;;  %986 = vst [vmem:[%s1585_s4 + $0xc8] sm:$0xff] %v954_v23 }
 0x120   :  { %v1096_v27 = vpop.f32.mrb[23].mxu0  ;;  %v1144_v28 = vpop.f32.mrb[23].mxu1 }
 0x121   :  { %v1097_v29 = vadd.f32 %v1096_v27, %v1095_v9  ;;  %v1145_v31 = vadd.f32 %v1144_v28, %v1143_v26  ;;  %v900_v33 = vmul.f32 %v1094_v24, %v1426_v12  ;;  %v916_v34 = vmul.f32 %v1142_v25, %v863_v32  ;;  %v883_v3 = vpop.permute.xlu0 %882  ;;  %v888_v19 = vpop.permute.xlu1 %887 }
 0x123   :  { %v939_v35 = vadd.f32 %v1439_v30, %v900_v33  ;;  %v955_v36 = vadd.f32 %v1439_v30, %v916_v34  ;;  %v901_v37 = vmul.f32 %v1097_v29, %v1424_v11  ;;  %v917_v5 = vmul.f32 %v1145_v31, %v868_v6 }
 0x125   :  { %v1098_v38 = vpop.f32.mrb[24].mxu0  ;;  %v1146_v39 = vpop.f32.mrb[24].mxu1  ;;  %971 = vst [vmem:[%s1585_s4 + $0x50] sm:$0xff] %v939_v35  ;;  %987 = vst [vmem:[%s1585_s4 + $0xd0] sm:$0xff] %v955_v36  ;;  %v940_v12 = vadd.f32 %v1439_v30, %v901_v37  ;;  %v956_v42 = vadd.f32 %v1439_v30, %v917_v5 }
 0x126   :  { %v1099_v40 = vpop.f32.mrb[25].mxu0  ;;  %v1147_v41 = vpop.f32.mrb[25].mxu1 }
 0x127   :  { %v1100_v43 = vadd.f32 %v1099_v40, %v1098_v38  ;;  %v1148_v44 = vadd.f32 %v1147_v41, %v1146_v39  ;;  %v1101_v11 = vpop.f32.mrb[26].mxu0  ;;  %v1149_v45 = vpop.f32.mrb[26].mxu1  ;;  %972 = vst [vmem:[%s1585_s4 + $0x58] sm:$0xff] %v940_v12  ;;  %988 = vst [vmem:[%s1585_s4 + $0xd8] sm:$0xff] %v956_v42 }
 0x128   :  { %v1102_v46 = vpop.f32.mrb[27].mxu0  ;;  %v1150_v47 = vpop.f32.mrb[27].mxu1 }
 0x129   :  { %v1103_v48 = vadd.f32 %v1102_v46, %v1101_v11  ;;  %v1151_v49 = vadd.f32 %v1150_v47, %v1149_v45  ;;  %v902_v51 = vmul.f32 %v1100_v43, %v1430_v14  ;;  %v918_v52 = vmul.f32 %v1148_v44, %v873_v50 }
 0x12b   :  { %v941_v54 = vadd.f32 %v1439_v30, %v902_v51  ;;  %v957_v8 = vadd.f32 %v1439_v30, %v918_v52  ;;  %v903_v55 = vmul.f32 %v1103_v48, %v1428_v13  ;;  %v919_v56 = vmul.f32 %v1151_v49, %v878_v53 }
 0x12d   :  { %v1104_v57 = vpop.f32.mrb[28].mxu0  ;;  %v1152_v7 = vpop.f32.mrb[28].mxu1  ;;  %973 = vst [vmem:[%s1585_s4 + $0x60] sm:$0xff] %v941_v54  ;;  %989 = vst [vmem:[%s1585_s4 + $0xe0] sm:$0xff] %v957_v8  ;;  %v942_v14 = vadd.f32 %v1439_v30, %v903_v55  ;;  %v958_v60 = vadd.f32 %v1439_v30, %v919_v56 }
 0x12e   :  { %v1105_v58 = vpop.f32.mrb[29].mxu0  ;;  %v1153_v59 = vpop.f32.mrb[29].mxu1 }
 0x12f   :  { %v1106_v61 = vadd.f32 %v1105_v58, %v1104_v57  ;;  %v1154_v62 = vadd.f32 %v1153_v59, %v1152_v7  ;;  %v1107_v13 = vpop.f32.mrb[30].mxu0  ;;  %v1155_v63 = vpop.f32.mrb[30].mxu1  ;;  %974 = vst [vmem:[%s1585_s4 + $0x68] sm:$0xff] %v942_v14  ;;  %990 = vst [vmem:[%s1585_s4 + $0xe8] sm:$0xff] %v958_v60 }
 0x130   :  { %v1108_v0 = vpop.f32.mrb[31].mxu0  ;;  %v1156_v1 = vpop.f32.mrb[31].mxu1 }
 0x131   :  { %v1109_v2 = vadd.f32 %v1108_v0, %v1107_v13  ;;  %v1157_v4 = vadd.f32 %v1156_v1, %v1155_v63  ;;  %v904_v17 = vmul.f32 %v1106_v61, %v1434_v16  ;;  %v920_v18 = vmul.f32 %v1154_v62, %v883_v3 }
 0x133   :  { %v943_v20 = vadd.f32 %v1439_v30, %v904_v17  ;;  %v959_v21 = vadd.f32 %v1439_v30, %v920_v18  ;;  %v905_v22 = vmul.f32 %v1109_v2, %v1432_v15  ;;  %v921_v10 = vmul.f32 %v1157_v4, %v888_v19 }
 0x135   :  { %975 = vst [vmem:[%s1585_s4 + $0x70] sm:$0xff] %v943_v20  ;;  %991 = vst [vmem:[%s1585_s4 + $0xf0] sm:$0xff] %v959_v21  ;;  %v944_v23 = vadd.f32 %v1439_v30, %v905_v22  ;;  %v960_v16 = vadd.f32 %v1439_v30, %v921_v10 }
 0x137   :  { %976 = vst [vmem:[%s1585_s4 + $0x78] sm:$0xff] %v944_v23  ;;  %992 = vst [vmem:[%s1585_s4 + $0xf8] sm:$0xff] %v960_v16 }

</bundles_post_ra>
